<compile_context>
chip_gen: v6e
topology: v6e:2x2x1
jax: 0.10.0
libtpu: 0.0.40
codegen_flags: <defaults>
</compile_context>

<pallas_src>
import functools

import jax
import jax.numpy as jnp
from jax.experimental import pallas as pl
from jax.experimental.pallas import tpu as pltpu


# ----------------------------- fused kernel --------------------------------

def _fused_ae_kernel(x_ref, wb_ref, bb_ref, we_ref, be_ref,
                     wenc_ref, benc_ref, wdec_ref, bdec_ref,
                     o_ref, *, c_in, c_feat, p):
    """decode(encode(x)) for one (bm, C*H*W) row block, all intermediates in vregs.

    x_ref : (bm, c_in*p)   f32   (NCHW flattened row-major -> free reshape)
    wb_ref: (c_feat*p, Z)  bf16  bottleneck weight   bb_ref: (1, Z)        f32
    we_ref: (Z, c_feat*p)  bf16  expand weight       be_ref: (1, c_feat*p) f32
    wenc/benc/wdec/bdec   : tiny 1x1-conv params, flattened, in SMEM
    o_ref : (bm, c_in*p)   f32
    """
    # ---- encode_features (1x1 conv + ReLU) fused with encode_bottleneck ----
    # Per 256-wide channel slab: VPU broadcast-FMA conv, ReLU, bf16 pack, then
    # accumulate that slab's contribution to z on the MXU (f32 accumulator).
    x_sl = [x_ref[:, c * p:(c + 1) * p] for c in range(c_in)]        # (bm, p)
    z = bb_ref[...]                                                  # (1, Z)
    for c1 in range(c_feat):
        acc = wenc_ref[0 * c_feat + c1] * x_sl[0]
        for c in range(1, c_in):
            acc = acc + wenc_ref[c * c_feat + c1] * x_sl[c]
        y_slab = jnp.maximum(acc + benc_ref[c1], 0.0).astype(jnp.bfloat16)
        z = z + jnp.dot(y_slab, wb_ref[c1 * p:(c1 + 1) * p, :],
                        preferred_element_type=jnp.float32)          # (bm, Z)
    z_bf = z.astype(jnp.bfloat16)

    # ---- decode_expand (Linear + ReLU) fused with decode_features (1x1 conv)
    # Per 256-wide slab of the expanded feature map: MXU dot, bias, ReLU, then
    # VPU broadcast-FMA scatter into the C output-channel accumulators.
    out_acc = [None] * c_in
    for c1 in range(c_feat):
        e = jnp.dot(z_bf, we_ref[:, c1 * p:(c1 + 1) * p],
                    preferred_element_type=jnp.float32)
        e = jnp.maximum(e + be_ref[:, c1 * p:(c1 + 1) * p], 0.0)     # (bm, p)
        for c in range(c_in):
            contrib = wdec_ref[c1 * c_in + c] * e
            out_acc[c] = contrib if out_acc[c] is None else out_acc[c] + contrib
    for c in range(c_in):
        # Lane-aligned 256-wide slab store (unmasked vst).
        o_ref[:, c * p:(c + 1) * p] = (out_acc[c] + bdec_ref[c]).astype(o_ref.dtype)


# ------------------------------ AE wrapper ---------------------------------

class AEPallas:
    """Concrete AEBase; forward() is a single fused, row-blocked Pallas kernel."""

    def __init__(self, key, c_in=4, c_feat=8, h=16, w=16, z_dim=32):
        self.c_in, self.c_feat, self.h, self.w, self.z = c_in, c_feat, h, w, z_dim
        flat = c_feat * h * w
        ks = jax.random.split(key, 8)
        s = 0.05
        w_enc = s * jax.random.normal(ks[0], (c_in, c_feat), jnp.float32)
        b_enc = s * jax.random.normal(ks[1], (c_feat,), jnp.float32)
        w_bot = s * jax.random.normal(ks[2], (flat, z_dim), jnp.float32)
        b_bot = s * jax.random.normal(ks[3], (z_dim,), jnp.float32)
        w_exp = s * jax.random.normal(ks[4], (z_dim, flat), jnp.float32)
        b_exp = s * jax.random.normal(ks[5], (flat,), jnp.float32)
        w_dec = s * jax.random.normal(ks[6], (c_feat, c_in), jnp.float32)
        b_dec = s * jax.random.normal(ks[7], (c_in,), jnp.float32)

        # Original-form params (used by the pure-JAX reference stages below).
        self.w_enc, self.b_enc, self.w_dec, self.b_dec = w_enc, b_enc, w_dec, b_dec

        # Kernel-ready params: big matrices in bf16 (intentional precision
        # choice, halves HBM traffic), tiny 1x1-conv params flattened for
        # SMEM, biases pre-shaped (1, n).
        self.kp = dict(
            w_bot=w_bot.astype(jnp.bfloat16),        # (flat, Z)
            b_bot=b_bot.reshape(1, z_dim),           # (1, Z)    f32
            w_exp=w_exp.astype(jnp.bfloat16),        # (Z, flat)
            b_exp=b_exp.reshape(1, flat),            # (1, flat) f32
            w_enc_s=w_enc.reshape(-1),               # (c_in*c_feat,) f32 SMEM
            b_enc_s=b_enc,                           # (c_feat,)      f32 SMEM
            w_dec_s=w_dec.reshape(-1),               # (c_feat*c_in,) f32 SMEM
            b_dec_s=b_dec,                           # (c_in,)        f32 SMEM
        )

    # ---- fused forward (one pallas_call, row-blocked grid) ------------------
    def forward(self, x):
        n = x.shape[0]
        c_in, c_feat, z_dim = self.c_in, self.c_feat, self.z
        p = self.h * self.w
        flat = c_feat * p
        width = c_in * p
        kp = self.kp

        # Row block: 128-aligned (full MXU rows on v5e's 128-wide and a clean
        # half-tile on v6e/v7x) once the batch allows; multiple of 8 otherwise.
        bm = 128 if n >= 128 else max(8, -(-n // 8) * 8)
        n_pad = -(-n // bm) * bm

        x2d = x.reshape(n, width)                    # NCHW row-major: free
        if n_pad != n:
            x2d = jnp.pad(x2d, ((0, n_pad - n), (0, 0)))

        smem = pl.BlockSpec(memory_space=pltpu.MemorySpace.SMEM)

        grid_spec = pltpu.PrefetchScalarGridSpec(
            num_scalar_prefetch=0,
            grid=(n_pad // bm,),
            in_specs=[
                pl.BlockSpec((bm, width), lambda i: (i, 0)),      # x row block
                pl.BlockSpec((flat, z_dim), lambda i: (0, 0)),    # w_bot (resident)
                pl.BlockSpec((1, z_dim), lambda i: (0, 0)),       # b_bot (resident)
                pl.BlockSpec((z_dim, flat), lambda i: (0, 0)),    # w_exp (resident)
                pl.BlockSpec((1, flat), lambda i: (0, 0)),        # b_exp (resident)
                smem, smem, smem, smem,                           # tiny conv params
            ],
            out_specs=pl.BlockSpec((bm, width), lambda i: (i, 0)),
        )

        flops = n_pad * (2 * flat * z_dim            # bottleneck matmul
                         + 2 * z_dim * flat          # expand matmul
                         + 2 * 2 * c_in * c_feat * p)  # two 1x1 convs
        bytes_accessed = (2 * n_pad * width * 4
                          + kp["w_bot"].size * 2 + kp["w_exp"].size * 2
                          + kp["b_bot"].size * 4 + kp["b_exp"].size * 4)

        out2d = pl.pallas_call(
            functools.partial(_fused_ae_kernel, c_in=c_in, c_feat=c_feat, p=p),
            out_shape=jax.ShapeDtypeStruct((n_pad, width), x.dtype),
            grid_spec=grid_spec,
            compiler_params=pltpu.CompilerParams(
                dimension_semantics=("parallel",)),
            cost_estimate=pl.CostEstimate(flops=flops, transcendentals=0,
                                          bytes_accessed=bytes_accessed),
        )(x2d, kp["w_bot"], kp["b_bot"], kp["w_exp"], kp["b_exp"],
          kp["w_enc_s"], kp["b_enc_s"], kp["w_dec_s"], kp["b_dec_s"])

        return out2d[:n].reshape(n, c_in, self.h, self.w)

    # ---- Pure-JAX reference stages (AEBase composition), for verification --
    def encode_features(self, x):                    # NCHW -> NCHW (C1)
        y = jnp.einsum("nchw,cf->nfhw", x, self.w_enc)
        return jnp.maximum(y + self.b_enc[None, :, None, None], 0.0)

    def encode_bottleneck(self, x):                  # NCHW -> (N, Z)
        n = x.shape[0]
        flat = x.reshape(n, -1)                      # PyTorch flatten order
        return (jnp.dot(flat.astype(jnp.bfloat16), self.kp["w_bot"],
                        preferred_element_type=jnp.float32) + self.kp["b_bot"])

    def decode_expand(self, z):                      # (N, Z) -> NCHW (C1)
        n = z.shape[0]
        e = jnp.dot(z.astype(jnp.bfloat16), self.kp["w_exp"],
                    preferred_element_type=jnp.float32) + self.kp["b_exp"]
        return jnp.maximum(e, 0.0).reshape(n, self.c_feat, self.h, self.w)

    def decode_features(self, x):                    # NCHW (C1) -> NCHW (C)
        y = jnp.einsum("nfhw,fc->nchw", x, self.w_dec)
        return y + self.b_dec[None, :, None, None]

    def encode(self, x):
        out = x
        out = self.encode_features(out)
        out = self.encode_bottleneck(out)
        return out

    def decode(self, x):
        out = x
        out = self.decode_expand(out)
        out = self.decode_features(out)
        return out

    # TODO(synk): calc_cold_loss / calc_hot_loss are abstract and unused by
    # forward(); not implemented here.


# --------------------------------- main ------------------------------------

if __name__ == "__main__":
    key = jax.random.PRNGKey(0)
    k_params, k_input = jax.random.split(key)

    model = AEPallas(k_params, c_in=4, c_feat=8, h=16, w=16, z_dim=32)

    # NCHW input, matching the PyTorch convention.
    x = jax.random.normal(k_input, (2, 4, 16, 16), jnp.float32)

    y = jax.jit(model.forward)(x)
    jax.block_until_ready(y)
    assert y.shape == x.shape and y.dtype == x.dtype

    # Fused kernel must match the staged AEBase composition decode(encode(x)).
    y_ref = jax.jit(lambda v: model.decode(model.encode(v)))(x)
    jax.block_until_ready(y_ref)
    err = float(jnp.max(jnp.abs(y - y_ref)))
    assert err < 2e-3, f"fused kernel mismatch vs staged reference: {err}"

    print("KERNEL_OK")
</pallas_src>

<mosaic_0001>
module attributes {stable_mosaic.version = 11 : i64} {
  func.func @_fused_ae_kernel(%arg0: i32, %arg1: memref<8x1024xf32, #tpu.memory_space<vmem>>, %arg2: memref<2048x32xbf16, #tpu.memory_space<vmem>>, %arg3: memref<1x32xf32, #tpu.memory_space<vmem>>, %arg4: memref<32x2048xbf16, #tpu.memory_space<vmem>>, %arg5: memref<1x2048xf32, #tpu.memory_space<vmem>>, %arg6: memref<32xf32, #tpu.memory_space<smem>>, %arg7: memref<8xf32, #tpu.memory_space<smem>>, %arg8: memref<32xf32, #tpu.memory_space<smem>>, %arg9: memref<4xf32, #tpu.memory_space<smem>>, %arg10: memref<8x1024xf32, #tpu.memory_space<vmem>>) attributes {dimension_semantics = [#tpu.dimension_semantics<parallel>], iteration_bounds = array<i64: 1>, scalar_prefetch = 0 : i64, scratch_operands = 0 : i64, tpu.core_type = #tpu.core_type<tc>, window_params = [{transform_indices = @transform_0, window_bounds = array<i64: 8, 1024>}, {pipeline_mode = #tpu.pipeline_mode<synchronous>, transform_indices = @transform_1, window_bounds = array<i64: 2048, 32>}, {pipeline_mode = #tpu.pipeline_mode<synchronous>, transform_indices = @transform_2, window_bounds = array<i64: 1, 32>}, {pipeline_mode = #tpu.pipeline_mode<synchronous>, transform_indices = @transform_3, window_bounds = array<i64: 32, 2048>}, {pipeline_mode = #tpu.pipeline_mode<synchronous>, transform_indices = @transform_4, window_bounds = array<i64: 1, 2048>}, {transform_indices = @transform_5, window_bounds = array<i64: 32>}, {transform_indices = @transform_6, window_bounds = array<i64: 8>}, {transform_indices = @transform_7, window_bounds = array<i64: 32>}, {transform_indices = @transform_8, window_bounds = array<i64: 4>}, {transform_indices = @transform_9, window_bounds = array<i64: 8, 1024>}]} {
    %c0 = arith.constant 0 : index
    %c0_0 = arith.constant 0 : index
    %0 = vector.load %arg1[%c0, %c0_0] : memref<8x1024xf32, #tpu.memory_space<vmem>>, vector<8x256xf32>
    %c0_1 = arith.constant 0 : index
    %c256 = arith.constant 256 : index
    %1 = vector.load %arg1[%c0_1, %c256] : memref<8x1024xf32, #tpu.memory_space<vmem>>, vector<8x256xf32>
    %c0_2 = arith.constant 0 : index
    %c512 = arith.constant 512 : index
    %2 = vector.load %arg1[%c0_2, %c512] : memref<8x1024xf32, #tpu.memory_space<vmem>>, vector<8x256xf32>
    %c0_3 = arith.constant 0 : index
    %c768 = arith.constant 768 : index
    %3 = vector.load %arg1[%c0_3, %c768] : memref<8x1024xf32, #tpu.memory_space<vmem>>, vector<8x256xf32>
    %c0_4 = arith.constant 0 : index
    %c0_5 = arith.constant 0 : index
    %4 = vector.load %arg3[%c0_4, %c0_5] : memref<1x32xf32, #tpu.memory_space<vmem>>, vector<1x32xf32>
    %c0_6 = arith.constant 0 : index
    %5 = memref.load %arg6[%c0_6] : memref<32xf32, #tpu.memory_space<smem>>
    %6 = vector.broadcast %5 : f32 to vector<8x256xf32>
    %7 = arith.mulf %6, %0 : vector<8x256xf32>
    %c8 = arith.constant 8 : index
    %8 = memref.load %arg6[%c8] : memref<32xf32, #tpu.memory_space<smem>>
    %9 = vector.broadcast %8 : f32 to vector<8x256xf32>
    %10 = arith.mulf %9, %1 : vector<8x256xf32>
    %11 = arith.addf %7, %10 : vector<8x256xf32>
    %c16 = arith.constant 16 : index
    %12 = memref.load %arg6[%c16] : memref<32xf32, #tpu.memory_space<smem>>
    %13 = vector.broadcast %12 : f32 to vector<8x256xf32>
    %14 = arith.mulf %13, %2 : vector<8x256xf32>
    %15 = arith.addf %11, %14 : vector<8x256xf32>
    %c24 = arith.constant 24 : index
    %16 = memref.load %arg6[%c24] : memref<32xf32, #tpu.memory_space<smem>>
    %17 = vector.broadcast %16 : f32 to vector<8x256xf32>
    %18 = arith.mulf %17, %3 : vector<8x256xf32>
    %19 = arith.addf %15, %18 : vector<8x256xf32>
    %c0_7 = arith.constant 0 : index
    %20 = memref.load %arg7[%c0_7] : memref<8xf32, #tpu.memory_space<smem>>
    %21 = vector.broadcast %20 : f32 to vector<8x256xf32>
    %22 = arith.addf %19, %21 : vector<8x256xf32>
    %cst = arith.constant 0.000000e+00 : f32
    %23 = vector.broadcast %cst : f32 to vector<8x256xf32>
    %24 = arith.maximumf %22, %23 : vector<8x256xf32>
    %25 = arith.truncf %24 : vector<8x256xf32> to vector<8x256xbf16>
    %c0_8 = arith.constant 0 : index
    %c0_9 = arith.constant 0 : index
    %26 = vector.load %arg2[%c0_8, %c0_9] : memref<2048x32xbf16, #tpu.memory_space<vmem>>, vector<256x32xbf16>
    %cst_10 = arith.constant dense<0.000000e+00> : vector<8x32xf32>
    %27 = tpu.matmul %25, %26, %cst_10 {dimension_numbers = #tpu.dot_dimension_numbers<[1], [0], [0], [1], [0, 0, 1, 1], [], []>} : vector<8x256xbf16>, vector<256x32xbf16>, vector<8x32xf32> -> vector<8x32xf32>
    %28 = vector.broadcast %4 : vector<1x32xf32> to vector<8x32xf32>
    %29 = arith.addf %28, %27 : vector<8x32xf32>
    %c1 = arith.constant 1 : index
    %30 = memref.load %arg6[%c1] : memref<32xf32, #tpu.memory_space<smem>>
    %31 = vector.broadcast %30 : f32 to vector<8x256xf32>
    %32 = arith.mulf %31, %0 : vector<8x256xf32>
    %c9 = arith.constant 9 : index
    %33 = memref.load %arg6[%c9] : memref<32xf32, #tpu.memory_space<smem>>
    %34 = vector.broadcast %33 : f32 to vector<8x256xf32>
    %35 = arith.mulf %34, %1 : vector<8x256xf32>
    %36 = arith.addf %32, %35 : vector<8x256xf32>
    %c17 = arith.constant 17 : index
    %37 = memref.load %arg6[%c17] : memref<32xf32, #tpu.memory_space<smem>>
    %38 = vector.broadcast %37 : f32 to vector<8x256xf32>
    %39 = arith.mulf %38, %2 : vector<8x256xf32>
    %40 = arith.addf %36, %39 : vector<8x256xf32>
    %c25 = arith.constant 25 : index
    %41 = memref.load %arg6[%c25] : memref<32xf32, #tpu.memory_space<smem>>
    %42 = vector.broadcast %41 : f32 to vector<8x256xf32>
    %43 = arith.mulf %42, %3 : vector<8x256xf32>
    %44 = arith.addf %40, %43 : vector<8x256xf32>
    %c1_11 = arith.constant 1 : index
    %45 = memref.load %arg7[%c1_11] : memref<8xf32, #tpu.memory_space<smem>>
    %46 = vector.broadcast %45 : f32 to vector<8x256xf32>
    %47 = arith.addf %44, %46 : vector<8x256xf32>
    %cst_12 = arith.constant 0.000000e+00 : f32
    %48 = vector.broadcast %cst_12 : f32 to vector<8x256xf32>
    %49 = arith.maximumf %47, %48 : vector<8x256xf32>
    %50 = arith.truncf %49 : vector<8x256xf32> to vector<8x256xbf16>
    %c256_13 = arith.constant 256 : index
    %c0_14 = arith.constant 0 : index
    %51 = vector.load %arg2[%c256_13, %c0_14] : memref<2048x32xbf16, #tpu.memory_space<vmem>>, vector<256x32xbf16>
    %cst_15 = arith.constant dense<0.000000e+00> : vector<8x32xf32>
    %52 = tpu.matmul %50, %51, %cst_15 {dimension_numbers = #tpu.dot_dimension_numbers<[1], [0], [0], [1], [0, 0, 1, 1], [], []>} : vector<8x256xbf16>, vector<256x32xbf16>, vector<8x32xf32> -> vector<8x32xf32>
    %53 = arith.addf %29, %52 : vector<8x32xf32>
    %c2 = arith.constant 2 : index
    %54 = memref.load %arg6[%c2] : memref<32xf32, #tpu.memory_space<smem>>
    %55 = vector.broadcast %54 : f32 to vector<8x256xf32>
    %56 = arith.mulf %55, %0 : vector<8x256xf32>
    %c10 = arith.constant 10 : index
    %57 = memref.load %arg6[%c10] : memref<32xf32, #tpu.memory_space<smem>>
    %58 = vector.broadcast %57 : f32 to vector<8x256xf32>
    %59 = arith.mulf %58, %1 : vector<8x256xf32>
    %60 = arith.addf %56, %59 : vector<8x256xf32>
    %c18 = arith.constant 18 : index
    %61 = memref.load %arg6[%c18] : memref<32xf32, #tpu.memory_space<smem>>
    %62 = vector.broadcast %61 : f32 to vector<8x256xf32>
    %63 = arith.mulf %62, %2 : vector<8x256xf32>
    %64 = arith.addf %60, %63 : vector<8x256xf32>
    %c26 = arith.constant 26 : index
    %65 = memref.load %arg6[%c26] : memref<32xf32, #tpu.memory_space<smem>>
    %66 = vector.broadcast %65 : f32 to vector<8x256xf32>
    %67 = arith.mulf %66, %3 : vector<8x256xf32>
    %68 = arith.addf %64, %67 : vector<8x256xf32>
    %c2_16 = arith.constant 2 : index
    %69 = memref.load %arg7[%c2_16] : memref<8xf32, #tpu.memory_space<smem>>
    %70 = vector.broadcast %69 : f32 to vector<8x256xf32>
    %71 = arith.addf %68, %70 : vector<8x256xf32>
    %cst_17 = arith.constant 0.000000e+00 : f32
    %72 = vector.broadcast %cst_17 : f32 to vector<8x256xf32>
    %73 = arith.maximumf %71, %72 : vector<8x256xf32>
    %74 = arith.truncf %73 : vector<8x256xf32> to vector<8x256xbf16>
    %c512_18 = arith.constant 512 : index
    %c0_19 = arith.constant 0 : index
    %75 = vector.load %arg2[%c512_18, %c0_19] : memref<2048x32xbf16, #tpu.memory_space<vmem>>, vector<256x32xbf16>
    %cst_20 = arith.constant dense<0.000000e+00> : vector<8x32xf32>
    %76 = tpu.matmul %74, %75, %cst_20 {dimension_numbers = #tpu.dot_dimension_numbers<[1], [0], [0], [1], [0, 0, 1, 1], [], []>} : vector<8x256xbf16>, vector<256x32xbf16>, vector<8x32xf32> -> vector<8x32xf32>
    %77 = arith.addf %53, %76 : vector<8x32xf32>
    %c3 = arith.constant 3 : index
    %78 = memref.load %arg6[%c3] : memref<32xf32, #tpu.memory_space<smem>>
    %79 = vector.broadcast %78 : f32 to vector<8x256xf32>
    %80 = arith.mulf %79, %0 : vector<8x256xf32>
    %c11 = arith.constant 11 : index
    %81 = memref.load %arg6[%c11] : memref<32xf32, #tpu.memory_space<smem>>
    %82 = vector.broadcast %81 : f32 to vector<8x256xf32>
    %83 = arith.mulf %82, %1 : vector<8x256xf32>
    %84 = arith.addf %80, %83 : vector<8x256xf32>
    %c19 = arith.constant 19 : index
    %85 = memref.load %arg6[%c19] : memref<32xf32, #tpu.memory_space<smem>>
    %86 = vector.broadcast %85 : f32 to vector<8x256xf32>
    %87 = arith.mulf %86, %2 : vector<8x256xf32>
    %88 = arith.addf %84, %87 : vector<8x256xf32>
    %c27 = arith.constant 27 : index
    %89 = memref.load %arg6[%c27] : memref<32xf32, #tpu.memory_space<smem>>
    %90 = vector.broadcast %89 : f32 to vector<8x256xf32>
    %91 = arith.mulf %90, %3 : vector<8x256xf32>
    %92 = arith.addf %88, %91 : vector<8x256xf32>
    %c3_21 = arith.constant 3 : index
    %93 = memref.load %arg7[%c3_21] : memref<8xf32, #tpu.memory_space<smem>>
    %94 = vector.broadcast %93 : f32 to vector<8x256xf32>
    %95 = arith.addf %92, %94 : vector<8x256xf32>
    %cst_22 = arith.constant 0.000000e+00 : f32
    %96 = vector.broadcast %cst_22 : f32 to vector<8x256xf32>
    %97 = arith.maximumf %95, %96 : vector<8x256xf32>
    %98 = arith.truncf %97 : vector<8x256xf32> to vector<8x256xbf16>
    %c768_23 = arith.constant 768 : index
    %c0_24 = arith.constant 0 : index
    %99 = vector.load %arg2[%c768_23, %c0_24] : memref<2048x32xbf16, #tpu.memory_space<vmem>>, vector<256x32xbf16>
    %cst_25 = arith.constant dense<0.000000e+00> : vector<8x32xf32>
    %100 = tpu.matmul %98, %99, %cst_25 {dimension_numbers = #tpu.dot_dimension_numbers<[1], [0], [0], [1], [0, 0, 1, 1], [], []>} : vector<8x256xbf16>, vector<256x32xbf16>, vector<8x32xf32> -> vector<8x32xf32>
    %101 = arith.addf %77, %100 : vector<8x32xf32>
    %c4 = arith.constant 4 : index
    %102 = memref.load %arg6[%c4] : memref<32xf32, #tpu.memory_space<smem>>
    %103 = vector.broadcast %102 : f32 to vector<8x256xf32>
    %104 = arith.mulf %103, %0 : vector<8x256xf32>
    %c12 = arith.constant 12 : index
    %105 = memref.load %arg6[%c12] : memref<32xf32, #tpu.memory_space<smem>>
    %106 = vector.broadcast %105 : f32 to vector<8x256xf32>
    %107 = arith.mulf %106, %1 : vector<8x256xf32>
    %108 = arith.addf %104, %107 : vector<8x256xf32>
    %c20 = arith.constant 20 : index
    %109 = memref.load %arg6[%c20] : memref<32xf32, #tpu.memory_space<smem>>
    %110 = vector.broadcast %109 : f32 to vector<8x256xf32>
    %111 = arith.mulf %110, %2 : vector<8x256xf32>
    %112 = arith.addf %108, %111 : vector<8x256xf32>
    %c28 = arith.constant 28 : index
    %113 = memref.load %arg6[%c28] : memref<32xf32, #tpu.memory_space<smem>>
    %114 = vector.broadcast %113 : f32 to vector<8x256xf32>
    %115 = arith.mulf %114, %3 : vector<8x256xf32>
    %116 = arith.addf %112, %115 : vector<8x256xf32>
    %c4_26 = arith.constant 4 : index
    %117 = memref.load %arg7[%c4_26] : memref<8xf32, #tpu.memory_space<smem>>
    %118 = vector.broadcast %117 : f32 to vector<8x256xf32>
    %119 = arith.addf %116, %118 : vector<8x256xf32>
    %cst_27 = arith.constant 0.000000e+00 : f32
    %120 = vector.broadcast %cst_27 : f32 to vector<8x256xf32>
    %121 = arith.maximumf %119, %120 : vector<8x256xf32>
    %122 = arith.truncf %121 : vector<8x256xf32> to vector<8x256xbf16>
    %c1024 = arith.constant 1024 : index
    %c0_28 = arith.constant 0 : index
    %123 = vector.load %arg2[%c1024, %c0_28] : memref<2048x32xbf16, #tpu.memory_space<vmem>>, vector<256x32xbf16>
    %cst_29 = arith.constant dense<0.000000e+00> : vector<8x32xf32>
    %124 = tpu.matmul %122, %123, %cst_29 {dimension_numbers = #tpu.dot_dimension_numbers<[1], [0], [0], [1], [0, 0, 1, 1], [], []>} : vector<8x256xbf16>, vector<256x32xbf16>, vector<8x32xf32> -> vector<8x32xf32>
    %125 = arith.addf %101, %124 : vector<8x32xf32>
    %c5 = arith.constant 5 : index
    %126 = memref.load %arg6[%c5] : memref<32xf32, #tpu.memory_space<smem>>
    %127 = vector.broadcast %126 : f32 to vector<8x256xf32>
    %128 = arith.mulf %127, %0 : vector<8x256xf32>
    %c13 = arith.constant 13 : index
    %129 = memref.load %arg6[%c13] : memref<32xf32, #tpu.memory_space<smem>>
    %130 = vector.broadcast %129 : f32 to vector<8x256xf32>
    %131 = arith.mulf %130, %1 : vector<8x256xf32>
    %132 = arith.addf %128, %131 : vector<8x256xf32>
    %c21 = arith.constant 21 : index
    %133 = memref.load %arg6[%c21] : memref<32xf32, #tpu.memory_space<smem>>
    %134 = vector.broadcast %133 : f32 to vector<8x256xf32>
    %135 = arith.mulf %134, %2 : vector<8x256xf32>
    %136 = arith.addf %132, %135 : vector<8x256xf32>
    %c29 = arith.constant 29 : index
    %137 = memref.load %arg6[%c29] : memref<32xf32, #tpu.memory_space<smem>>
    %138 = vector.broadcast %137 : f32 to vector<8x256xf32>
    %139 = arith.mulf %138, %3 : vector<8x256xf32>
    %140 = arith.addf %136, %139 : vector<8x256xf32>
    %c5_30 = arith.constant 5 : index
    %141 = memref.load %arg7[%c5_30] : memref<8xf32, #tpu.memory_space<smem>>
    %142 = vector.broadcast %141 : f32 to vector<8x256xf32>
    %143 = arith.addf %140, %142 : vector<8x256xf32>
    %cst_31 = arith.constant 0.000000e+00 : f32
    %144 = vector.broadcast %cst_31 : f32 to vector<8x256xf32>
    %145 = arith.maximumf %143, %144 : vector<8x256xf32>
    %146 = arith.truncf %145 : vector<8x256xf32> to vector<8x256xbf16>
    %c1280 = arith.constant 1280 : index
    %c0_32 = arith.constant 0 : index
    %147 = vector.load %arg2[%c1280, %c0_32] : memref<2048x32xbf16, #tpu.memory_space<vmem>>, vector<256x32xbf16>
    %cst_33 = arith.constant dense<0.000000e+00> : vector<8x32xf32>
    %148 = tpu.matmul %146, %147, %cst_33 {dimension_numbers = #tpu.dot_dimension_numbers<[1], [0], [0], [1], [0, 0, 1, 1], [], []>} : vector<8x256xbf16>, vector<256x32xbf16>, vector<8x32xf32> -> vector<8x32xf32>
    %149 = arith.addf %125, %148 : vector<8x32xf32>
    %c6 = arith.constant 6 : index
    %150 = memref.load %arg6[%c6] : memref<32xf32, #tpu.memory_space<smem>>
    %151 = vector.broadcast %150 : f32 to vector<8x256xf32>
    %152 = arith.mulf %151, %0 : vector<8x256xf32>
    %c14 = arith.constant 14 : index
    %153 = memref.load %arg6[%c14] : memref<32xf32, #tpu.memory_space<smem>>
    %154 = vector.broadcast %153 : f32 to vector<8x256xf32>
    %155 = arith.mulf %154, %1 : vector<8x256xf32>
    %156 = arith.addf %152, %155 : vector<8x256xf32>
    %c22 = arith.constant 22 : index
    %157 = memref.load %arg6[%c22] : memref<32xf32, #tpu.memory_space<smem>>
    %158 = vector.broadcast %157 : f32 to vector<8x256xf32>
    %159 = arith.mulf %158, %2 : vector<8x256xf32>
    %160 = arith.addf %156, %159 : vector<8x256xf32>
    %c30 = arith.constant 30 : index
    %161 = memref.load %arg6[%c30] : memref<32xf32, #tpu.memory_space<smem>>
    %162 = vector.broadcast %161 : f32 to vector<8x256xf32>
    %163 = arith.mulf %162, %3 : vector<8x256xf32>
    %164 = arith.addf %160, %163 : vector<8x256xf32>
    %c6_34 = arith.constant 6 : index
    %165 = memref.load %arg7[%c6_34] : memref<8xf32, #tpu.memory_space<smem>>
    %166 = vector.broadcast %165 : f32 to vector<8x256xf32>
    %167 = arith.addf %164, %166 : vector<8x256xf32>
    %cst_35 = arith.constant 0.000000e+00 : f32
    %168 = vector.broadcast %cst_35 : f32 to vector<8x256xf32>
    %169 = arith.maximumf %167, %168 : vector<8x256xf32>
    %170 = arith.truncf %169 : vector<8x256xf32> to vector<8x256xbf16>
    %c1536 = arith.constant 1536 : index
    %c0_36 = arith.constant 0 : index
    %171 = vector.load %arg2[%c1536, %c0_36] : memref<2048x32xbf16, #tpu.memory_space<vmem>>, vector<256x32xbf16>
    %cst_37 = arith.constant dense<0.000000e+00> : vector<8x32xf32>
    %172 = tpu.matmul %170, %171, %cst_37 {dimension_numbers = #tpu.dot_dimension_numbers<[1], [0], [0], [1], [0, 0, 1, 1], [], []>} : vector<8x256xbf16>, vector<256x32xbf16>, vector<8x32xf32> -> vector<8x32xf32>
    %173 = arith.addf %149, %172 : vector<8x32xf32>
    %c7 = arith.constant 7 : index
    %174 = memref.load %arg6[%c7] : memref<32xf32, #tpu.memory_space<smem>>
    %175 = vector.broadcast %174 : f32 to vector<8x256xf32>
    %176 = arith.mulf %175, %0 : vector<8x256xf32>
    %c15 = arith.constant 15 : index
    %177 = memref.load %arg6[%c15] : memref<32xf32, #tpu.memory_space<smem>>
    %178 = vector.broadcast %177 : f32 to vector<8x256xf32>
    %179 = arith.mulf %178, %1 : vector<8x256xf32>
    %180 = arith.addf %176, %179 : vector<8x256xf32>
    %c23 = arith.constant 23 : index
    %181 = memref.load %arg6[%c23] : memref<32xf32, #tpu.memory_space<smem>>
    %182 = vector.broadcast %181 : f32 to vector<8x256xf32>
    %183 = arith.mulf %182, %2 : vector<8x256xf32>
    %184 = arith.addf %180, %183 : vector<8x256xf32>
    %c31 = arith.constant 31 : index
    %185 = memref.load %arg6[%c31] : memref<32xf32, #tpu.memory_space<smem>>
    %186 = vector.broadcast %185 : f32 to vector<8x256xf32>
    %187 = arith.mulf %186, %3 : vector<8x256xf32>
    %188 = arith.addf %184, %187 : vector<8x256xf32>
    %c7_38 = arith.constant 7 : index
    %189 = memref.load %arg7[%c7_38] : memref<8xf32, #tpu.memory_space<smem>>
    %190 = vector.broadcast %189 : f32 to vector<8x256xf32>
    %191 = arith.addf %188, %190 : vector<8x256xf32>
    %cst_39 = arith.constant 0.000000e+00 : f32
    %192 = vector.broadcast %cst_39 : f32 to vector<8x256xf32>
    %193 = arith.maximumf %191, %192 : vector<8x256xf32>
    %194 = arith.truncf %193 : vector<8x256xf32> to vector<8x256xbf16>
    %c1792 = arith.constant 1792 : index
    %c0_40 = arith.constant 0 : index
    %195 = vector.load %arg2[%c1792, %c0_40] : memref<2048x32xbf16, #tpu.memory_space<vmem>>, vector<256x32xbf16>
    %cst_41 = arith.constant dense<0.000000e+00> : vector<8x32xf32>
    %196 = tpu.matmul %194, %195, %cst_41 {dimension_numbers = #tpu.dot_dimension_numbers<[1], [0], [0], [1], [0, 0, 1, 1], [], []>} : vector<8x256xbf16>, vector<256x32xbf16>, vector<8x32xf32> -> vector<8x32xf32>
    %197 = arith.addf %173, %196 : vector<8x32xf32>
    %198 = arith.truncf %197 : vector<8x32xf32> to vector<8x32xbf16>
    %c0_42 = arith.constant 0 : index
    %c0_43 = arith.constant 0 : index
    %199 = vector.load %arg4[%c0_42, %c0_43] : memref<32x2048xbf16, #tpu.memory_space<vmem>>, vector<32x256xbf16>
    %cst_44 = arith.constant dense<0.000000e+00> : vector<8x256xf32>
    %200 = tpu.matmul %198, %199, %cst_44 {dimension_numbers = #tpu.dot_dimension_numbers<[1], [0], [0], [1], [0, 0, 1, 1], [], []>} : vector<8x32xbf16>, vector<32x256xbf16>, vector<8x256xf32> -> vector<8x256xf32>
    %c0_45 = arith.constant 0 : index
    %c0_46 = arith.constant 0 : index
    %201 = vector.load %arg5[%c0_45, %c0_46] : memref<1x2048xf32, #tpu.memory_space<vmem>>, vector<1x256xf32>
    %202 = vector.broadcast %201 : vector<1x256xf32> to vector<8x256xf32>
    %203 = arith.addf %200, %202 : vector<8x256xf32>
    %cst_47 = arith.constant 0.000000e+00 : f32
    %204 = vector.broadcast %cst_47 : f32 to vector<8x256xf32>
    %205 = arith.maximumf %203, %204 : vector<8x256xf32>
    %c0_48 = arith.constant 0 : index
    %206 = memref.load %arg8[%c0_48] : memref<32xf32, #tpu.memory_space<smem>>
    %207 = vector.broadcast %206 : f32 to vector<8x256xf32>
    %208 = arith.mulf %207, %205 : vector<8x256xf32>
    %c1_49 = arith.constant 1 : index
    %209 = memref.load %arg8[%c1_49] : memref<32xf32, #tpu.memory_space<smem>>
    %210 = vector.broadcast %209 : f32 to vector<8x256xf32>
    %211 = arith.mulf %210, %205 : vector<8x256xf32>
    %c2_50 = arith.constant 2 : index
    %212 = memref.load %arg8[%c2_50] : memref<32xf32, #tpu.memory_space<smem>>
    %213 = vector.broadcast %212 : f32 to vector<8x256xf32>
    %214 = arith.mulf %213, %205 : vector<8x256xf32>
    %c3_51 = arith.constant 3 : index
    %215 = memref.load %arg8[%c3_51] : memref<32xf32, #tpu.memory_space<smem>>
    %216 = vector.broadcast %215 : f32 to vector<8x256xf32>
    %217 = arith.mulf %216, %205 : vector<8x256xf32>
    %c0_52 = arith.constant 0 : index
    %c256_53 = arith.constant 256 : index
    %218 = vector.load %arg4[%c0_52, %c256_53] : memref<32x2048xbf16, #tpu.memory_space<vmem>>, vector<32x256xbf16>
    %cst_54 = arith.constant dense<0.000000e+00> : vector<8x256xf32>
    %219 = tpu.matmul %198, %218, %cst_54 {dimension_numbers = #tpu.dot_dimension_numbers<[1], [0], [0], [1], [0, 0, 1, 1], [], []>} : vector<8x32xbf16>, vector<32x256xbf16>, vector<8x256xf32> -> vector<8x256xf32>
    %c0_55 = arith.constant 0 : index
    %c256_56 = arith.constant 256 : index
    %220 = vector.load %arg5[%c0_55, %c256_56] : memref<1x2048xf32, #tpu.memory_space<vmem>>, vector<1x256xf32>
    %221 = vector.broadcast %220 : vector<1x256xf32> to vector<8x256xf32>
    %222 = arith.addf %219, %221 : vector<8x256xf32>
    %cst_57 = arith.constant 0.000000e+00 : f32
    %223 = vector.broadcast %cst_57 : f32 to vector<8x256xf32>
    %224 = arith.maximumf %222, %223 : vector<8x256xf32>
    %c4_58 = arith.constant 4 : index
    %225 = memref.load %arg8[%c4_58] : memref<32xf32, #tpu.memory_space<smem>>
    %226 = vector.broadcast %225 : f32 to vector<8x256xf32>
    %227 = arith.mulf %226, %224 : vector<8x256xf32>
    %228 = arith.addf %208, %227 : vector<8x256xf32>
    %c5_59 = arith.constant 5 : index
    %229 = memref.load %arg8[%c5_59] : memref<32xf32, #tpu.memory_space<smem>>
    %230 = vector.broadcast %229 : f32 to vector<8x256xf32>
    %231 = arith.mulf %230, %224 : vector<8x256xf32>
    %232 = arith.addf %211, %231 : vector<8x256xf32>
    %c6_60 = arith.constant 6 : index
    %233 = memref.load %arg8[%c6_60] : memref<32xf32, #tpu.memory_space<smem>>
    %234 = vector.broadcast %233 : f32 to vector<8x256xf32>
    %235 = arith.mulf %234, %224 : vector<8x256xf32>
    %236 = arith.addf %214, %235 : vector<8x256xf32>
    %c7_61 = arith.constant 7 : index
    %237 = memref.load %arg8[%c7_61] : memref<32xf32, #tpu.memory_space<smem>>
    %238 = vector.broadcast %237 : f32 to vector<8x256xf32>
    %239 = arith.mulf %238, %224 : vector<8x256xf32>
    %240 = arith.addf %217, %239 : vector<8x256xf32>
    %c0_62 = arith.constant 0 : index
    %c512_63 = arith.constant 512 : index
    %241 = vector.load %arg4[%c0_62, %c512_63] : memref<32x2048xbf16, #tpu.memory_space<vmem>>, vector<32x256xbf16>
    %cst_64 = arith.constant dense<0.000000e+00> : vector<8x256xf32>
    %242 = tpu.matmul %198, %241, %cst_64 {dimension_numbers = #tpu.dot_dimension_numbers<[1], [0], [0], [1], [0, 0, 1, 1], [], []>} : vector<8x32xbf16>, vector<32x256xbf16>, vector<8x256xf32> -> vector<8x256xf32>
    %c0_65 = arith.constant 0 : index
    %c512_66 = arith.constant 512 : index
    %243 = vector.load %arg5[%c0_65, %c512_66] : memref<1x2048xf32, #tpu.memory_space<vmem>>, vector<1x256xf32>
    %244 = vector.broadcast %243 : vector<1x256xf32> to vector<8x256xf32>
    %245 = arith.addf %242, %244 : vector<8x256xf32>
    %cst_67 = arith.constant 0.000000e+00 : f32
    %246 = vector.broadcast %cst_67 : f32 to vector<8x256xf32>
    %247 = arith.maximumf %245, %246 : vector<8x256xf32>
    %c8_68 = arith.constant 8 : index
    %248 = memref.load %arg8[%c8_68] : memref<32xf32, #tpu.memory_space<smem>>
    %249 = vector.broadcast %248 : f32 to vector<8x256xf32>
    %250 = arith.mulf %249, %247 : vector<8x256xf32>
    %251 = arith.addf %228, %250 : vector<8x256xf32>
    %c9_69 = arith.constant 9 : index
    %252 = memref.load %arg8[%c9_69] : memref<32xf32, #tpu.memory_space<smem>>
    %253 = vector.broadcast %252 : f32 to vector<8x256xf32>
    %254 = arith.mulf %253, %247 : vector<8x256xf32>
    %255 = arith.addf %232, %254 : vector<8x256xf32>
    %c10_70 = arith.constant 10 : index
    %256 = memref.load %arg8[%c10_70] : memref<32xf32, #tpu.memory_space<smem>>
    %257 = vector.broadcast %256 : f32 to vector<8x256xf32>
    %258 = arith.mulf %257, %247 : vector<8x256xf32>
    %259 = arith.addf %236, %258 : vector<8x256xf32>
    %c11_71 = arith.constant 11 : index
    %260 = memref.load %arg8[%c11_71] : memref<32xf32, #tpu.memory_space<smem>>
    %261 = vector.broadcast %260 : f32 to vector<8x256xf32>
    %262 = arith.mulf %261, %247 : vector<8x256xf32>
    %263 = arith.addf %240, %262 : vector<8x256xf32>
    %c0_72 = arith.constant 0 : index
    %c768_73 = arith.constant 768 : index
    %264 = vector.load %arg4[%c0_72, %c768_73] : memref<32x2048xbf16, #tpu.memory_space<vmem>>, vector<32x256xbf16>
    %cst_74 = arith.constant dense<0.000000e+00> : vector<8x256xf32>
    %265 = tpu.matmul %198, %264, %cst_74 {dimension_numbers = #tpu.dot_dimension_numbers<[1], [0], [0], [1], [0, 0, 1, 1], [], []>} : vector<8x32xbf16>, vector<32x256xbf16>, vector<8x256xf32> -> vector<8x256xf32>
    %c0_75 = arith.constant 0 : index
    %c768_76 = arith.constant 768 : index
    %266 = vector.load %arg5[%c0_75, %c768_76] : memref<1x2048xf32, #tpu.memory_space<vmem>>, vector<1x256xf32>
    %267 = vector.broadcast %266 : vector<1x256xf32> to vector<8x256xf32>
    %268 = arith.addf %265, %267 : vector<8x256xf32>
    %cst_77 = arith.constant 0.000000e+00 : f32
    %269 = vector.broadcast %cst_77 : f32 to vector<8x256xf32>
    %270 = arith.maximumf %268, %269 : vector<8x256xf32>
    %c12_78 = arith.constant 12 : index
    %271 = memref.load %arg8[%c12_78] : memref<32xf32, #tpu.memory_space<smem>>
    %272 = vector.broadcast %271 : f32 to vector<8x256xf32>
    %273 = arith.mulf %272, %270 : vector<8x256xf32>
    %274 = arith.addf %251, %273 : vector<8x256xf32>
    %c13_79 = arith.constant 13 : index
    %275 = memref.load %arg8[%c13_79] : memref<32xf32, #tpu.memory_space<smem>>
    %276 = vector.broadcast %275 : f32 to vector<8x256xf32>
    %277 = arith.mulf %276, %270 : vector<8x256xf32>
    %278 = arith.addf %255, %277 : vector<8x256xf32>
    %c14_80 = arith.constant 14 : index
    %279 = memref.load %arg8[%c14_80] : memref<32xf32, #tpu.memory_space<smem>>
    %280 = vector.broadcast %279 : f32 to vector<8x256xf32>
    %281 = arith.mulf %280, %270 : vector<8x256xf32>
    %282 = arith.addf %259, %281 : vector<8x256xf32>
    %c15_81 = arith.constant 15 : index
    %283 = memref.load %arg8[%c15_81] : memref<32xf32, #tpu.memory_space<smem>>
    %284 = vector.broadcast %283 : f32 to vector<8x256xf32>
    %285 = arith.mulf %284, %270 : vector<8x256xf32>
    %286 = arith.addf %263, %285 : vector<8x256xf32>
    %c0_82 = arith.constant 0 : index
    %c1024_83 = arith.constant 1024 : index
    %287 = vector.load %arg4[%c0_82, %c1024_83] : memref<32x2048xbf16, #tpu.memory_space<vmem>>, vector<32x256xbf16>
    %cst_84 = arith.constant dense<0.000000e+00> : vector<8x256xf32>
    %288 = tpu.matmul %198, %287, %cst_84 {dimension_numbers = #tpu.dot_dimension_numbers<[1], [0], [0], [1], [0, 0, 1, 1], [], []>} : vector<8x32xbf16>, vector<32x256xbf16>, vector<8x256xf32> -> vector<8x256xf32>
    %c0_85 = arith.constant 0 : index
    %c1024_86 = arith.constant 1024 : index
    %289 = vector.load %arg5[%c0_85, %c1024_86] : memref<1x2048xf32, #tpu.memory_space<vmem>>, vector<1x256xf32>
    %290 = vector.broadcast %289 : vector<1x256xf32> to vector<8x256xf32>
    %291 = arith.addf %288, %290 : vector<8x256xf32>
    %cst_87 = arith.constant 0.000000e+00 : f32
    %292 = vector.broadcast %cst_87 : f32 to vector<8x256xf32>
    %293 = arith.maximumf %291, %292 : vector<8x256xf32>
    %c16_88 = arith.constant 16 : index
    %294 = memref.load %arg8[%c16_88] : memref<32xf32, #tpu.memory_space<smem>>
    %295 = vector.broadcast %294 : f32 to vector<8x256xf32>
    %296 = arith.mulf %295, %293 : vector<8x256xf32>
    %297 = arith.addf %274, %296 : vector<8x256xf32>
    %c17_89 = arith.constant 17 : index
    %298 = memref.load %arg8[%c17_89] : memref<32xf32, #tpu.memory_space<smem>>
    %299 = vector.broadcast %298 : f32 to vector<8x256xf32>
    %300 = arith.mulf %299, %293 : vector<8x256xf32>
    %301 = arith.addf %278, %300 : vector<8x256xf32>
    %c18_90 = arith.constant 18 : index
    %302 = memref.load %arg8[%c18_90] : memref<32xf32, #tpu.memory_space<smem>>
    %303 = vector.broadcast %302 : f32 to vector<8x256xf32>
    %304 = arith.mulf %303, %293 : vector<8x256xf32>
    %305 = arith.addf %282, %304 : vector<8x256xf32>
    %c19_91 = arith.constant 19 : index
    %306 = memref.load %arg8[%c19_91] : memref<32xf32, #tpu.memory_space<smem>>
    %307 = vector.broadcast %306 : f32 to vector<8x256xf32>
    %308 = arith.mulf %307, %293 : vector<8x256xf32>
    %309 = arith.addf %286, %308 : vector<8x256xf32>
    %c0_92 = arith.constant 0 : index
    %c1280_93 = arith.constant 1280 : index
    %310 = vector.load %arg4[%c0_92, %c1280_93] : memref<32x2048xbf16, #tpu.memory_space<vmem>>, vector<32x256xbf16>
    %cst_94 = arith.constant dense<0.000000e+00> : vector<8x256xf32>
    %311 = tpu.matmul %198, %310, %cst_94 {dimension_numbers = #tpu.dot_dimension_numbers<[1], [0], [0], [1], [0, 0, 1, 1], [], []>} : vector<8x32xbf16>, vector<32x256xbf16>, vector<8x256xf32> -> vector<8x256xf32>
    %c0_95 = arith.constant 0 : index
    %c1280_96 = arith.constant 1280 : index
    %312 = vector.load %arg5[%c0_95, %c1280_96] : memref<1x2048xf32, #tpu.memory_space<vmem>>, vector<1x256xf32>
    %313 = vector.broadcast %312 : vector<1x256xf32> to vector<8x256xf32>
    %314 = arith.addf %311, %313 : vector<8x256xf32>
    %cst_97 = arith.constant 0.000000e+00 : f32
    %315 = vector.broadcast %cst_97 : f32 to vector<8x256xf32>
    %316 = arith.maximumf %314, %315 : vector<8x256xf32>
    %c20_98 = arith.constant 20 : index
    %317 = memref.load %arg8[%c20_98] : memref<32xf32, #tpu.memory_space<smem>>
    %318 = vector.broadcast %317 : f32 to vector<8x256xf32>
    %319 = arith.mulf %318, %316 : vector<8x256xf32>
    %320 = arith.addf %297, %319 : vector<8x256xf32>
    %c21_99 = arith.constant 21 : index
    %321 = memref.load %arg8[%c21_99] : memref<32xf32, #tpu.memory_space<smem>>
    %322 = vector.broadcast %321 : f32 to vector<8x256xf32>
    %323 = arith.mulf %322, %316 : vector<8x256xf32>
    %324 = arith.addf %301, %323 : vector<8x256xf32>
    %c22_100 = arith.constant 22 : index
    %325 = memref.load %arg8[%c22_100] : memref<32xf32, #tpu.memory_space<smem>>
    %326 = vector.broadcast %325 : f32 to vector<8x256xf32>
    %327 = arith.mulf %326, %316 : vector<8x256xf32>
    %328 = arith.addf %305, %327 : vector<8x256xf32>
    %c23_101 = arith.constant 23 : index
    %329 = memref.load %arg8[%c23_101] : memref<32xf32, #tpu.memory_space<smem>>
    %330 = vector.broadcast %329 : f32 to vector<8x256xf32>
    %331 = arith.mulf %330, %316 : vector<8x256xf32>
    %332 = arith.addf %309, %331 : vector<8x256xf32>
    %c0_102 = arith.constant 0 : index
    %c1536_103 = arith.constant 1536 : index
    %333 = vector.load %arg4[%c0_102, %c1536_103] : memref<32x2048xbf16, #tpu.memory_space<vmem>>, vector<32x256xbf16>
    %cst_104 = arith.constant dense<0.000000e+00> : vector<8x256xf32>
    %334 = tpu.matmul %198, %333, %cst_104 {dimension_numbers = #tpu.dot_dimension_numbers<[1], [0], [0], [1], [0, 0, 1, 1], [], []>} : vector<8x32xbf16>, vector<32x256xbf16>, vector<8x256xf32> -> vector<8x256xf32>
    %c0_105 = arith.constant 0 : index
    %c1536_106 = arith.constant 1536 : index
    %335 = vector.load %arg5[%c0_105, %c1536_106] : memref<1x2048xf32, #tpu.memory_space<vmem>>, vector<1x256xf32>
    %336 = vector.broadcast %335 : vector<1x256xf32> to vector<8x256xf32>
    %337 = arith.addf %334, %336 : vector<8x256xf32>
    %cst_107 = arith.constant 0.000000e+00 : f32
    %338 = vector.broadcast %cst_107 : f32 to vector<8x256xf32>
    %339 = arith.maximumf %337, %338 : vector<8x256xf32>
    %c24_108 = arith.constant 24 : index
    %340 = memref.load %arg8[%c24_108] : memref<32xf32, #tpu.memory_space<smem>>
    %341 = vector.broadcast %340 : f32 to vector<8x256xf32>
    %342 = arith.mulf %341, %339 : vector<8x256xf32>
    %343 = arith.addf %320, %342 : vector<8x256xf32>
    %c25_109 = arith.constant 25 : index
    %344 = memref.load %arg8[%c25_109] : memref<32xf32, #tpu.memory_space<smem>>
    %345 = vector.broadcast %344 : f32 to vector<8x256xf32>
    %346 = arith.mulf %345, %339 : vector<8x256xf32>
    %347 = arith.addf %324, %346 : vector<8x256xf32>
    %c26_110 = arith.constant 26 : index
    %348 = memref.load %arg8[%c26_110] : memref<32xf32, #tpu.memory_space<smem>>
    %349 = vector.broadcast %348 : f32 to vector<8x256xf32>
    %350 = arith.mulf %349, %339 : vector<8x256xf32>
    %351 = arith.addf %328, %350 : vector<8x256xf32>
    %c27_111 = arith.constant 27 : index
    %352 = memref.load %arg8[%c27_111] : memref<32xf32, #tpu.memory_space<smem>>
    %353 = vector.broadcast %352 : f32 to vector<8x256xf32>
    %354 = arith.mulf %353, %339 : vector<8x256xf32>
    %355 = arith.addf %332, %354 : vector<8x256xf32>
    %c0_112 = arith.constant 0 : index
    %c1792_113 = arith.constant 1792 : index
    %356 = vector.load %arg4[%c0_112, %c1792_113] : memref<32x2048xbf16, #tpu.memory_space<vmem>>, vector<32x256xbf16>
    %cst_114 = arith.constant dense<0.000000e+00> : vector<8x256xf32>
    %357 = tpu.matmul %198, %356, %cst_114 {dimension_numbers = #tpu.dot_dimension_numbers<[1], [0], [0], [1], [0, 0, 1, 1], [], []>} : vector<8x32xbf16>, vector<32x256xbf16>, vector<8x256xf32> -> vector<8x256xf32>
    %c0_115 = arith.constant 0 : index
    %c1792_116 = arith.constant 1792 : index
    %358 = vector.load %arg5[%c0_115, %c1792_116] : memref<1x2048xf32, #tpu.memory_space<vmem>>, vector<1x256xf32>
    %359 = vector.broadcast %358 : vector<1x256xf32> to vector<8x256xf32>
    %360 = arith.addf %357, %359 : vector<8x256xf32>
    %cst_117 = arith.constant 0.000000e+00 : f32
    %361 = vector.broadcast %cst_117 : f32 to vector<8x256xf32>
    %362 = arith.maximumf %360, %361 : vector<8x256xf32>
    %c28_118 = arith.constant 28 : index
    %363 = memref.load %arg8[%c28_118] : memref<32xf32, #tpu.memory_space<smem>>
    %364 = vector.broadcast %363 : f32 to vector<8x256xf32>
    %365 = arith.mulf %364, %362 : vector<8x256xf32>
    %366 = arith.addf %343, %365 : vector<8x256xf32>
    %c29_119 = arith.constant 29 : index
    %367 = memref.load %arg8[%c29_119] : memref<32xf32, #tpu.memory_space<smem>>
    %368 = vector.broadcast %367 : f32 to vector<8x256xf32>
    %369 = arith.mulf %368, %362 : vector<8x256xf32>
    %370 = arith.addf %347, %369 : vector<8x256xf32>
    %c30_120 = arith.constant 30 : index
    %371 = memref.load %arg8[%c30_120] : memref<32xf32, #tpu.memory_space<smem>>
    %372 = vector.broadcast %371 : f32 to vector<8x256xf32>
    %373 = arith.mulf %372, %362 : vector<8x256xf32>
    %374 = arith.addf %351, %373 : vector<8x256xf32>
    %c31_121 = arith.constant 31 : index
    %375 = memref.load %arg8[%c31_121] : memref<32xf32, #tpu.memory_space<smem>>
    %376 = vector.broadcast %375 : f32 to vector<8x256xf32>
    %377 = arith.mulf %376, %362 : vector<8x256xf32>
    %378 = arith.addf %355, %377 : vector<8x256xf32>
    %c0_122 = arith.constant 0 : index
    %379 = memref.load %arg9[%c0_122] : memref<4xf32, #tpu.memory_space<smem>>
    %380 = vector.broadcast %379 : f32 to vector<8x256xf32>
    %381 = arith.addf %366, %380 : vector<8x256xf32>
    %c0_123 = arith.constant 0 : index
    %c0_124 = arith.constant 0 : index
    %382 = vector.load %arg10[%c0_123, %c0_124] : memref<8x1024xf32, #tpu.memory_space<vmem>>, vector<8x256xf32>
    tpu.vector_store %arg10[%c0_123, %c0_124], %381 {strides = array<i32>} : memref<8x1024xf32, #tpu.memory_space<vmem>>, vector<8x256xf32>,
    %c1_125 = arith.constant 1 : index
    %383 = memref.load %arg9[%c1_125] : memref<4xf32, #tpu.memory_space<smem>>
    %384 = vector.broadcast %383 : f32 to vector<8x256xf32>
    %385 = arith.addf %370, %384 : vector<8x256xf32>
    %c0_126 = arith.constant 0 : index
    %c256_127 = arith.constant 256 : index
    %386 = vector.load %arg10[%c0_126, %c256_127] : memref<8x1024xf32, #tpu.memory_space<vmem>>, vector<8x256xf32>
    tpu.vector_store %arg10[%c0_126, %c256_127], %385 {strides = array<i32>} : memref<8x1024xf32, #tpu.memory_space<vmem>>, vector<8x256xf32>,
    %c2_128 = arith.constant 2 : index
    %387 = memref.load %arg9[%c2_128] : memref<4xf32, #tpu.memory_space<smem>>
    %388 = vector.broadcast %387 : f32 to vector<8x256xf32>
    %389 = arith.addf %374, %388 : vector<8x256xf32>
    %c0_129 = arith.constant 0 : index
    %c512_130 = arith.constant 512 : index
    %390 = vector.load %arg10[%c0_129, %c512_130] : memref<8x1024xf32, #tpu.memory_space<vmem>>, vector<8x256xf32>
    tpu.vector_store %arg10[%c0_129, %c512_130], %389 {strides = array<i32>} : memref<8x1024xf32, #tpu.memory_space<vmem>>, vector<8x256xf32>,
    %c3_131 = arith.constant 3 : index
    %391 = memref.load %arg9[%c3_131] : memref<4xf32, #tpu.memory_space<smem>>
    %392 = vector.broadcast %391 : f32 to vector<8x256xf32>
    %393 = arith.addf %378, %392 : vector<8x256xf32>
    %c0_132 = arith.constant 0 : index
    %c768_133 = arith.constant 768 : index
    %394 = vector.load %arg10[%c0_132, %c768_133] : memref<8x1024xf32, #tpu.memory_space<vmem>>, vector<8x256xf32>
    tpu.vector_store %arg10[%c0_132, %c768_133], %393 {strides = array<i32>} : memref<8x1024xf32, #tpu.memory_space<vmem>>, vector<8x256xf32>,
    return
  }
  func.func @transform_0(%arg0: i32) -> (i32, i32) {
    %c0_i32 = arith.constant 0 : i32
    %c0_i32_0 = arith.constant 0 : i32
    return %arg0, %c0_i32 : i32, i32
  }
  func.func @transform_1(%arg0: i32) -> (i32, i32) {
    %c0_i32 = arith.constant 0 : i32
    %c0_i32_0 = arith.constant 0 : i32
    %c0_i32_1 = arith.constant 0 : i32
    return %c0_i32, %c0_i32_0 : i32, i32
  }
  func.func @transform_2(%arg0: i32) -> (i32, i32) {
    %c0_i32 = arith.constant 0 : i32
    %c0_i32_0 = arith.constant 0 : i32
    %c0_i32_1 = arith.constant 0 : i32
    return %c0_i32, %c0_i32_0 : i32, i32
  }
  func.func @transform_3(%arg0: i32) -> (i32, i32) {
    %c0_i32 = arith.constant 0 : i32
    %c0_i32_0 = arith.constant 0 : i32
    %c0_i32_1 = arith.constant 0 : i32
    return %c0_i32, %c0_i32_0 : i32, i32
  }
  func.func @transform_4(%arg0: i32) -> (i32, i32) {
    %c0_i32 = arith.constant 0 : i32
    %c0_i32_0 = arith.constant 0 : i32
    %c0_i32_1 = arith.constant 0 : i32
    return %c0_i32, %c0_i32_0 : i32, i32
  }
  func.func @transform_5(%arg0: i32) -> i32 {
    %c0_i32 = arith.constant 0 : i32
    %c0_i32_0 = arith.constant 0 : i32
    return %c0_i32 : i32
  }
  func.func @transform_6(%arg0: i32) -> i32 {
    %c0_i32 = arith.constant 0 : i32
    %c0_i32_0 = arith.constant 0 : i32
    return %c0_i32 : i32
  }
  func.func @transform_7(%arg0: i32) -> i32 {
    %c0_i32 = arith.constant 0 : i32
    %c0_i32_0 = arith.constant 0 : i32
    return %c0_i32 : i32
  }
  func.func @transform_8(%arg0: i32) -> i32 {
    %c0_i32 = arith.constant 0 : i32
    %c0_i32_0 = arith.constant 0 : i32
    return %c0_i32 : i32
  }
  func.func @transform_9(%arg0: i32) -> (i32, i32) {
    %c0_i32 = arith.constant 0 : i32
    %c0_i32_0 = arith.constant 0 : i32
    return %arg0, %c0_i32 : i32, i32
  }
}

</mosaic_0001>

<bundles_post_ra>
// kernel: forward.1
= control target key start
LH: loop header
LB: loop body
LE: loop exit
PB: predicated region body
PF: predicated region fallthrough
CT: control target
= control target key end

     0   :  { %s3935_s0 = inlined_call_operand.vmem [shape: f32[8,1024], index: 0, kind: input, shape index: {}]   ;;  %s3936_s1 = inlined_call_operand.hbm [shape: bf16[2048,32], index: 1, kind: input, shape index: {}]   ;;  %s3937_s2 = inlined_call_operand.vmem [shape: f32[1,32], index: 2, kind: input, shape index: {}]   ;;  %s3938_s3 = inlined_call_operand.hbm [shape: bf16[32,2048], index: 3, kind: input, shape index: {}]   ;;  %s3939_s4 = inlined_call_operand.vmem [shape: f32[1,2048], index: 4, kind: input, shape index: {}]   ;;  %s3940_s5 = inlined_call_operand.vmem [shape: f32[32], index: 5, kind: input, shape index: {}]   ;;  %s3941_s6 = inlined_call_operand.vmem [shape: f32[8], index: 6, kind: input, shape index: {}]   ;;  %s3942_s7 = inlined_call_operand.vmem [shape: f32[32], index: 7, kind: input, shape index: {}]   ;;  %s3943_s8 = inlined_call_operand.vmem [shape: f32[4], index: 8, kind: input, shape index: {}]   ;;  %s3944_s9 = inlined_call_operand.vmem [shape: f32[8,1024], index: 9, kind: output, shape index: {}]  }
   0x1   :  { %3967 = sst [smem:[#allocation31_spill]] %s3944_s9 }
   0x2   :  { %14 = vsyncpa [#allocation3], 0 }
   0x3   :  { %15 = vsyncpa [#allocation6], 0 }
   0x4   :  { %16 = vsyncpa [#allocation4], 0 }
   0x5   :  { %17 = vsyncpa [#allocation9], 0  ;;  %s65_s11 = sshll.u32 %s3941_s6, 4  ;;  %s66_s11 = int_to_ptr.vmem [resolvable:$true] %s65_s11 }
   0x6   :  { %18 = vsyncpa [#allocation12], 0  ;;  %s3133_s12 = scalar_lea.vmem %s66_s11, 16  ;;  %p3138_p1 = scmp.lt.s32.totalorder %s66_s11, %s66_s11 }
   0x7   :  { %p3134_p0 = scmp.ne.s32.totalorder %s66_s11, %s3133_s12  ;;  %p3139_p2 = scmp.lt.s32.totalorder %s3133_s12, %s3133_s12 }
   0x9   :  { %p3140_p3 = por %p3139_p2, %p3138_p1 }
   0xb   :  { %p3141_p4 = pnand %p3140_p3, %p3134_p0 }
   0xd   :  { %3144 = shalt.err (!%p3141_p4)
}
   0xe   :  { %s3231_s13 = smov [#allocation8]   ;;  %s3232_s14 = smov [#allocation2]  }
   0xf   :  { %68 = dma.vmem_to_smem %s66_s11, 16, %s3231_s13, [#allocation9]  }
  0x10   :  { %s26_s15 = sshll.u32 %s3232_s14, 4  ;;  %s27_s15 = int_to_ptr.vmem [resolvable:$true] %s26_s15 }
  0x11   :  { %s3153_s16 = scalar_lea.vmem %s27_s15, 16384  ;;  %p3158_p6 = scmp.lt.s32.totalorder %s27_s15, %s27_s15 }
  0x12   :  { %p3154_p5 = scmp.ne.s32.totalorder %s27_s15, %s3153_s16  ;;  %p3159_p7 = scmp.lt.s32.totalorder %s3153_s16, %s3153_s16 }
  0x14   :  { %p3160_p8 = por %p3159_p7, %p3158_p6 }
  0x16   :  { %p3161_p9 = pnand %p3160_p8, %p3154_p5 }
  0x18   :  { %3164 = shalt.err (!%p3161_p9)
}
  0x19   :  { %s3233_s6 = smov 64   ;;  %s3234_s17 = smov 4  }
  0x1a   :  { %32 = dma.hbm_to_vmem [thread:$0]  %s3936_s1, 16384, %s27_s15, [#allocation3], %s3233_s6, %s3233_s6, %s3234_s17  }
  0x1b   :  { %s3235_s20 = smov [#allocation5]   ;;  %s55_s24 = sshll.u32 %s3940_s5, 4  ;;  %s56_s24 = int_to_ptr.vmem [resolvable:$true] %s55_s24 }
  0x1c   :  { %s40_s21 = sshll.u32 %s3235_s20, 4  ;;  %s41_s21 = int_to_ptr.vmem [resolvable:$true] %s40_s21 }
  0x1d   :  { %s3173_s25 = scalar_lea.vmem %s41_s21, 4096  ;;  %p3178_p11 = scmp.lt.s32.totalorder %s41_s21, %s41_s21 }
  0x1e   :  { %p3174_p10 = scmp.ne.s32.totalorder %s41_s21, %s3173_s25  ;;  %p3179_p12 = scmp.lt.s32.totalorder %s3173_s25, %s3173_s25 }
  0x20   :  { %p3180_p13 = por %p3179_p12, %p3178_p11 }
  0x22   :  { %p3181_p0 = pnand %p3180_p13, %p3174_p10 }
  0x24   :  { %3184 = shalt.err (!%p3181_p0)
}
  0x25   :  { %s3236_s26 = smov 1024   ;;  %s75_s30 = sshll.u32 %s3942_s7, 4  ;;  %s76_s30 = int_to_ptr.vmem [resolvable:$true] %s75_s30 }
  0x26   :  { %46 = dma.hbm_to_vmem [thread:$0]  %s3938_s3, 4096, %s41_s21, [#allocation6], %s3236_s26, %s3236_s26, %s3233_s6  }
  0x27   :  { %s3185_s10 = scalar_lea.vmem %s56_s24, 16  ;;  %p3190_p2 = scmp.lt.s32.totalorder %s56_s24, %s56_s24 }
  0x28   :  { %p3186_p1 = scmp.ne.s32.totalorder %s56_s24, %s3185_s10  ;;  %p3191_p3 = scmp.lt.s32.totalorder %s3185_s10, %s3185_s10 }
  0x2a   :  { %p3192_p4 = por %p3191_p3, %p3190_p2 }
  0x2c   :  { %p3193_p5 = pnand %p3192_p4, %p3186_p1 }
  0x2e   :  { %3196 = shalt.err (!%p3193_p5)
}
  0x2f   :  { %s3237_s5 = smov [#allocation7]   ;;  %s3197_s11 = scalar_lea.vmem %s76_s30, 16 }
  0x30   :  { %58 = dma.vmem_to_smem %s56_s24, 16, %s3237_s5, [#allocation4]  }
  0x31   :  { %p3198_p6 = scmp.ne.s32.totalorder %s76_s30, %s3197_s11  ;;  %p3202_p7 = scmp.lt.s32.totalorder %s76_s30, %s76_s30 }
  0x32   :  { %p3203_p8 = scmp.lt.s32.totalorder %s3197_s11, %s3197_s11 }
  0x34   :  { %p3204_p9 = por %p3203_p8, %p3202_p7 }
  0x36   :  { %p3205_p10 = pnand %p3204_p9, %p3198_p6 }
  0x38   :  { %3208 = shalt.err (!%p3205_p10)
}
  0x39   :  { %s3238_s3 = smov [#allocation10]   ;;  %s85_s13 = sshll.u32 %s3943_s8, 4  ;;  %s86_s13 = int_to_ptr.vmem [resolvable:$true] %s85_s13 }
  0x3a   :  { %78 = dma.vmem_to_smem %s76_s30, 16, %s3238_s3, [#allocation9]  }
  0x3b   :  { %s3209_s14 = scalar_lea.vmem %s86_s13, 16  ;;  %p3214_p12 = scmp.lt.s32.totalorder %s86_s13, %s86_s13 }
  0x3c   :  { %p3210_p11 = scmp.ne.s32.totalorder %s86_s13, %s3209_s14  ;;  %p3215_p13 = scmp.lt.s32.totalorder %s3209_s14, %s3209_s14 }
  0x3e   :  { %p3216_p0 = por %p3215_p13, %p3214_p12 }
  0x40   :  { %p3217_p1 = pnand %p3216_p0, %p3210_p11 }
  0x42   :  { %3220 = shalt.err (!%p3217_p1)
}
  0x43   :  { %s3239_s15 = smov [#allocation11]  }
  0x44   :  { %88 = dma.vmem_to_smem %s86_s13, 16, %s3239_s15, [#allocation12]  }
  0x45   :  { %3221 = dma.done.wait [#allocation3], 16384  }
  0x46   :  { %3222 = vsyncadd [#allocation3], 4294950912 }
  0x47   :  { %3223 = dma.done.wait [#allocation6], 4096  }
  0x48   :  { %3224 = vsyncadd [#allocation6], 4294963200 }
  0x49   :  { %3225 = dma.done.wait [#allocation4], 16  }
  0x4a   :  { %3226 = vsyncadd [#allocation4], 4294967280 }
  0x4b   :  { %3227 = dma.done.wait [#allocation9], 32  }
  0x4c   :  { %3228 = vsyncadd [#allocation9], 4294967264 }
  0x4d   :  { %3229 = dma.done.wait [#allocation12], 16  }
  0x4e   :  { %3230 = vsyncadd [#allocation12], 4294967280 }
  0x4f   :  { %107 = sfence }
  0x50   :  { %v2997_v0 = vld [vmem:[#allocation2 + $0x78] sm:$0xff]   ;;  %v3001_v4 = vld [vmem:[#allocation2 + $0x70] sm:$0xff]   ;;  %v3005_v8 = vld [vmem:[#allocation2 + $0x68] sm:$0xff]   ;;  %s118_s8 = sld [smem:[#allocation7]]  ;;  %vm1753_vm0 = vcmask 261120  }
  0x51   :  { %v2998_v1 = vld [vmem:[#allocation2 + $0xf8] sm:$0xff]   ;;  %2811 = vmatprep.subr.bf16.mxu0 %v2997_v0  ;;  %v3002_v5 = vld [vmem:[#allocation2 + $0xf0] sm:$0xff]   ;;  %v3006_v9 = vld [vmem:[#allocation2 + $0xe8] sm:$0xff]   ;;  %s2570_s16 = sld [smem:[#allocation7 + $0x8]] }
  0x52   :  { %v2999_v2 = vld [vmem:[#allocation2 + $0x38] sm:$0xff]   ;;  %2833 = vmatprep.subr.bf16.mxu1 %v2998_v1  ;;  %v3003_v6 = vld [vmem:[#allocation2 + $0x30] sm:$0xff]   ;;  %v3007_v10 = vld [vmem:[#allocation2 + $0x28] sm:$0xff]   ;;  %s2571_s20 = sld [smem:[#allocation7 + $0x10]] }
  0x53   :  { %v3000_v3 = vld [vmem:[#allocation2 + $0xb8] sm:$0xff]   ;;  %2812 = vmatpush3.bf16.msra.mxu0 %v2999_v2  ;;  %v3004_v7 = vld [vmem:[#allocation2 + $0xb0] sm:$0xff]   ;;  %v3008_v11 = vld [vmem:[#allocation2 + $0xa8] sm:$0xff]   ;;  %s2572_s25 = sld [smem:[#allocation7 + $0x18]] }
  0x54   :  { %2834 = vmatpush3.bf16.msra.mxu1 %v3000_v3  ;;  %2813 = vmatprep.subr.bf16.mxu0 %v3001_v4  ;;  %v3009_v12 = vld [vmem:[#allocation2 + $0x60] sm:$0xff]   ;;  %v3013_v16 = vld [vmem:[#allocation2 + $0x58] sm:$0xff]   ;;  %v3017_v20 = vld [vmem:[#allocation2 + $0x50] sm:$0xff]   ;;  %s3339_s29 = sld [smem:[#allocation8]] }
  0x55   :  { %2835 = vmatprep.subr.bf16.mxu1 %v3002_v5  ;;  %v3010_v13 = vld [vmem:[#allocation2 + $0xe0] sm:$0xff]   ;;  %v3014_v17 = vld [vmem:[#allocation2 + $0xd8] sm:$0xff]   ;;  %v3018_v21 = vld [vmem:[#allocation2 + $0xd0] sm:$0xff]   ;;  %s2590_s30 = sld [smem:[#allocation7 + $0x1]] }
  0x56   :  { %v3011_v14 = vld [vmem:[#allocation2 + $0x20] sm:$0xff]   ;;  %v3015_v18 = vld [vmem:[#allocation2 + $0x18] sm:$0xff]   ;;  %v3019_v22 = vld [vmem:[#allocation2 + $0x10] sm:$0xff]   ;;  %v119_v42 = vstv %s118_s8  ;;  %s2591_s7 = sld [smem:[#allocation7 + $0x9]] }
  0x57   :  { %2814 = vmatpush3.bf16.msra.mxu0 %v3003_v6  ;;  %v3012_v15 = vld [vmem:[#allocation2 + $0xa0] sm:$0xff]   ;;  %v3016_v19 = vld [vmem:[#allocation2 + $0x98] sm:$0xff]   ;;  %v3020_v23 = vld [vmem:[#allocation2 + $0x90] sm:$0xff]   ;;  %v123_v45 = vstv %s2570_s16  ;;  %s2592_s12 = sld [smem:[#allocation7 + $0x11]] }
  0x58   :  { %2836 = vmatpush3.bf16.msra.mxu1 %v3004_v7  ;;  %2815 = vmatprep.subr.bf16.mxu0 %v3005_v8  ;;  %v3021_v24 = vld [vmem:[#allocation2 + $0x48] sm:$0xff]   ;;  %v3025_v28 = vld [vmem:[#allocation2 + $0x40] sm:$0xff]   ;;  %v3322_v34 = vld [vmem:[%s3935_s0 + $0x10] sm:$0xff]  ;;  %v129_v48 = vstv %s2571_s20  ;;  %s2593_s13 = sld [smem:[#allocation7 + $0x19]] }
  0x59   :  { %2837 = vmatprep.subr.bf16.mxu1 %v3006_v9  ;;  %v3022_v25 = vld [vmem:[#allocation2 + $0xc8] sm:$0xff]   ;;  %v3026_v29 = vld [vmem:[#allocation2 + $0xc0] sm:$0xff]   ;;  %v3327_v35 = vld [vmem:[%s3935_s0 + $0x18] sm:$0xff]  ;;  %v124_v46 = vmul.f32 %v123_v45, %v3322_v34  ;;  %v135_v51 = vstv %s2572_s25  ;;  %s3359_s14 = sld [smem:[#allocation8 + $0x1]] }
  0x5a   :  { %v3023_v26 = vld [vmem:[#allocation2 + $0x8] sm:$0xff]   ;;  %v3027_v30 = vld [vmem:[#allocation2] sm:$0xff]   ;;  %v3029_v36 = vld [vmem:[#allocation2 + $0x178] sm:$0xff]   ;;  %v125_v47 = vmul.f32 %v123_v45, %v3327_v35  ;;  %v141_v61 = vstv %s3339_s29  ;;  %s2611_s15 = sld [smem:[#allocation7 + $0x2]] }
  0x5b   :  { %2816 = vmatpush3.bf16.msra.mxu0 %v3007_v10  ;;  %v3024_v27 = vld [vmem:[#allocation2 + $0x88] sm:$0xff]   ;;  %v3028_v31 = vld [vmem:[#allocation2 + $0x80] sm:$0xff]   ;;  %v3030_v37 = vld [vmem:[#allocation2 + $0x1f8] sm:$0xff]   ;;  %v324_v56 = vstv %s2590_s30  ;;  %s2612_s8 = sld [smem:[#allocation7 + $0xa]] }
  0x5c   :  { %2838 = vmatpush3.bf16.msra.mxu1 %v3008_v11  ;;  %2817 = vmatprep.subr.bf16.mxu0 %v3009_v12  ;;  %v3312_v32 = vld [vmem:[%s3935_s0] sm:$0xff]  ;;  %v3317_v33 = vld [vmem:[%s3935_s0 + $0x8] sm:$0xff]  ;;  %v3344_v40 = vld [vmem:[%s3935_s0 + $0x30] sm:$0xff]  ;;  %v328_v62 = vstv %s2591_s7  ;;  %s2613_s16 = sld [smem:[#allocation7 + $0x12]] }
  0x5d   :  { %2839 = vmatprep.subr.bf16.mxu1 %v3010_v13  ;;  %v3332_v38 = vld [vmem:[%s3935_s0 + $0x20] sm:$0xff]  ;;  %v3337_v39 = vld [vmem:[%s3935_s0 + $0x28] sm:$0xff]  ;;  %v3349_v41 = vld [vmem:[%s3935_s0 + $0x38] sm:$0xff]  ;;  %v120_v43 = vmul.f32 %v119_v42, %v3312_v32  ;;  %v121_v44 = vmul.f32 %v119_v42, %v3317_v33  ;;  %v136_v54 = vmul.f32 %v135_v51, %v3344_v40  ;;  %v325_v59 = vmul.f32 %v324_v56, %v3312_v32  ;;  %s3371_s6 = sld [smem:[#allocation7 + $0x1a]] }
  0x5e   :  { %v130_v49 = vmul.f32 %v129_v48, %v3332_v38  ;;  %v131_v50 = vmul.f32 %v129_v48, %v3337_v39  ;;  %v137_v55 = vmul.f32 %v135_v51, %v3349_v41  ;;  %v326_v60 = vmul.f32 %v324_v56, %v3317_v33  ;;  %v3039_v42 = vld [vmem:[#allocation2 + $0x128] sm:$0xff]   ;;  %v3047_v51 = vld [vmem:[#allocation2 + $0x118] sm:$0xff]   ;;  %s3373_s17 = sld [smem:[#allocation8 + $0x2]] }
  0x5f   :  { %2818 = vmatpush3.bf16.msra.mxu0 %v3011_v14  ;;  %v126_v52 = vadd.f32 %v124_v46, %v120_v43  ;;  %v127_v53 = vadd.f32 %v125_v47, %v121_v44  ;;  %v334_v63 = vstv %s2592_s12  ;;  %v329_v2 = vmul.f32 %v328_v62, %v3322_v34  ;;  %v3041_v43 = vld [vmem:[#allocation2 + $0x160] sm:$0xff]   ;;  %v3036_v44 = vld [vmem:[#allocation2 + $0x1b0] sm:$0xff]   ;;  %v3038_v45 = vld [vmem:[#allocation2 + $0x1e8] sm:$0xff]   ;;  %s3375_s18 = sld [smem:[#allocation7 + $0x3]] }
  0x60   :  { %2840 = vmatpush3.bf16.msra.mxu1 %v3012_v15  ;;  %2819 = vmatprep.subr.bf16.mxu0 %v3013_v16  ;;  %v330_v3 = vmul.f32 %v328_v62, %v3327_v35  ;;  %v335_v4 = vmul.f32 %v334_v63, %v3332_v38  ;;  %v336_v5 = vmul.f32 %v334_v63, %v3337_v39  ;;  %v340_v6 = vstv %s2593_s13  ;;  %v3043_v46 = vld [vmem:[#allocation2 + $0x120] sm:$0xff]   ;;  %v3045_v47 = vld [vmem:[#allocation2 + $0x158] sm:$0xff]   ;;  %v3040_v48 = vld [vmem:[#allocation2 + $0x1a8] sm:$0xff]   ;;  %s3377_s19 = sld [smem:[#allocation7 + $0xb]] }
  0x61   :  { %2841 = vmatprep.subr.bf16.mxu1 %v3014_v17  ;;  %v132_v57 = vadd.f32 %v130_v49, %v126_v52  ;;  %v133_v58 = vadd.f32 %v131_v50, %v127_v53  ;;  %v331_v9 = vadd.f32 %v329_v2, %v325_v59  ;;  %v341_v11 = vmul.f32 %v340_v6, %v3344_v40  ;;  %v3042_v49 = vld [vmem:[#allocation2 + $0x1e0] sm:$0xff]   ;;  %v3049_v52 = vld [vmem:[#allocation2 + $0x150] sm:$0xff]   ;;  %v3046_v53 = vld [vmem:[#allocation2 + $0x1d8] sm:$0xff]   ;;  %s3381_s20 = sld [smem:[#allocation7 + $0x13]] }
  0x62   :  { %v332_v10 = vadd.f32 %v330_v3, %v326_v60  ;;  %v342_v12 = vmul.f32 %v340_v6, %v3349_v41  ;;  %v346_v17 = vstv %s3359_s14  ;;  %v3044_v50 = vld [vmem:[#allocation2 + $0x1a0] sm:$0xff]   ;;  %v3053_v56 = vld [vmem:[#allocation2 + $0x148] sm:$0xff]   ;;  %v527_v62 = vstv %s2612_s8  ;;  %v3052_v63 = vld [vmem:[#allocation2 + $0x190] sm:$0xff]   ;;  %s3385_s21 = sld [smem:[#allocation7 + $0x1b]] }
  0x63   :  { %2820 = vmatpush3.bf16.msra.mxu0 %v3015_v18  ;;  %v138_v0 = vadd.f32 %v136_v54, %v132_v57  ;;  %v139_v1 = vadd.f32 %v137_v55, %v133_v58  ;;  %v337_v15 = vadd.f32 %v335_v4, %v331_v9  ;;  %v3051_v54 = vld [vmem:[#allocation2 + $0x110] sm:$0xff]   ;;  %v3048_v55 = vld [vmem:[#allocation2 + $0x198] sm:$0xff]   ;;  %v523_v57 = vstv %s2611_s15  ;;  %v3055_v59 = vld [vmem:[#allocation2 + $0x108] sm:$0xff]   ;;  %s3393_s22 = sld [smem:[#allocation8 + $0x3]] }
  0x64   :  { %2842 = vmatpush3.bf16.msra.mxu1 %v3016_v19  ;;  %2821 = vmatprep.subr.bf16.mxu0 %v3017_v20  ;;  %v338_v16 = vadd.f32 %v336_v5, %v332_v10  ;;  %v3050_v58 = vld [vmem:[#allocation2 + $0x1d0] sm:$0xff]   ;;  %v524_v60 = vmul.f32 %v523_v57, %v3312_v32  ;;  %v533_v2 = vstv %s2613_s16  ;;  %v3057_v3 = vld [vmem:[#allocation2 + $0x140] sm:$0xff]   ;;  %v539_v6 = vstv %s3371_s6  ;;  %s2653_s23 = sld [smem:[#allocation7 + $0x4]] }
  0x65   :  { %2843 = vmatprep.subr.bf16.mxu1 %v3018_v21  ;;  %v142_v7 = vadd.f32 %v141_v61, %v138_v0  ;;  %v143_v8 = vadd.f32 %v141_v61, %v139_v1  ;;  %v343_v19 = vadd.f32 %v341_v11, %v337_v15  ;;  %v525_v61 = vmul.f32 %v523_v57, %v3317_v33  ;;  %v3065_v57 = vld [vmem:[#allocation2 + $0x270] sm:$0xff]   ;;  %s2654_s24 = sld [smem:[#allocation7 + $0xc]] }
  0x66   :  { %v344_v20 = vadd.f32 %v342_v12, %v338_v16  ;;  %v528_v0 = vmul.f32 %v527_v62, %v3322_v34  ;;  %v529_v1 = vmul.f32 %v527_v62, %v3327_v35  ;;  %v534_v4 = vmul.f32 %v533_v2, %v3332_v38  ;;  %v3067_v62 = vld [vmem:[#allocation2 + $0x230] sm:$0xff]   ;;  %s2655_s25 = sld [smem:[#allocation7 + $0x14]] }
  0x67   :  { %2822 = vmatpush3.bf16.msra.mxu0 %v3019_v22  ;;  %v144_v13 = vmax.f32 %v142_v7, 0.0  ;;  %v145_v14 = vmax.f32 %v143_v8, 0.0  ;;  %v3031_v22 = vld [vmem:[#allocation2 + $0x138] sm:$0xff]   ;;  %v535_v5 = vmul.f32 %v533_v2, %v3337_v39  ;;  %v3054_v7 = vld [vmem:[#allocation2 + $0x1c8] sm:$0xff]   ;;  %v540_v10 = vmul.f32 %v539_v6, %v3344_v40  ;;  %s3408_s26 = sld [smem:[#allocation7 + $0x1c]] }
  0x68   :  { %2844 = vmatpush3.bf16.msra.mxu1 %v3020_v23  ;;  %2823 = vmatprep.subr.bf16.mxu0 %v3021_v24  ;;  %v3033_v23 = vld [vmem:[#allocation2 + $0x170] sm:$0xff]   ;;  %v347_v24 = vadd.f32 %v346_v17, %v343_v19  ;;  %v530_v8 = vadd.f32 %v528_v0, %v524_v60  ;;  %v531_v9 = vadd.f32 %v529_v1, %v525_v61  ;;  %v722_v12 = vstv %s3375_s18  ;;  %v3064_v2 = vld [vmem:[#allocation2 + $0x2b8] sm:$0xff]   ;;  %s3410_s27 = sld [smem:[#allocation8 + $0x4]] }
  0x69   :  { %2845 = vmatprep.subr.bf16.mxu1 %v3022_v25  ;;  %v147_v18 = vpack.c.bf16 %v145_v14, %v145_v14  ;;  %v146_v21 = vpack.c.bf16 %v144_v13, %v144_v13  ;;  %v348_v25 = vadd.f32 %v346_v17, %v344_v20  ;;  %v541_v11 = vmul.f32 %v539_v6, %v3349_v41  ;;  %v3059_v13 = vld [vmem:[#allocation2 + $0x100] sm:$0xff]   ;;  %v3068_v6 = vld [vmem:[#allocation2 + $0x2b0] sm:$0xff]   ;;  %s3412_s28 = sld [smem:[#allocation7 + $0x5]] }
  0x6a   :  { %v536_v14 = vadd.f32 %v534_v4, %v530_v8  ;;  %v537_v15 = vadd.f32 %v535_v5, %v531_v9  ;;  %v723_v16 = vmul.f32 %v722_v12, %v3312_v32  ;;  %v724_v17 = vmul.f32 %v722_v12, %v3317_v33  ;;  %v3071_v4 = vld [vmem:[#allocation2 + $0x228] sm:$0xff]   ;;  %v3073_v5 = vld [vmem:[#allocation2 + $0x260] sm:$0xff]   ;;  %v3077_v9 = vld [vmem:[#allocation2 + $0x258] sm:$0xff]   ;;  %s3414_s1 = sld [smem:[#allocation7 + $0xd]] }
  0x6b   :  { %2824 = vmatpush3.bf16.msra.mxu0 %v3023_v26  ;;  %308 = vmatprep.mubr.bf16.mxu0 %v147_v18  ;;  %v349_v26 = vmax.f32 %v347_v24, 0.0  ;;  %v545_v18 = vstv %s3373_s17  ;;  %v726_v19 = vstv %s3377_s19  ;;  %v732_v20 = vstv %s3381_s20  ;;  %v3075_v8 = vld [vmem:[#allocation2 + $0x220] sm:$0xff]   ;;  %s3418_s29 = sld [smem:[#allocation7 + $0x15]] }
  0x6c   :  { %2846 = vmatpush3.bf16.msra.mxu1 %v3024_v27  ;;  %2825 = vmatprep.subr.bf16.mxu0 %v3025_v28  ;;  %v350_v27 = vmax.f32 %v348_v25, 0.0  ;;  %v3035_v28 = vld [vmem:[#allocation2 + $0x130] sm:$0xff]   ;;  %v543_v24 = vadd.f32 %v541_v11, %v537_v15  ;;  %v727_v25 = vmul.f32 %v726_v19, %v3322_v34  ;;  %v3074_v11 = vld [vmem:[#allocation2 + $0x2e0] sm:$0xff]   ;;  %v3078_v15 = vld [vmem:[#allocation2 + $0x2d8] sm:$0xff]   ;;  %s3422_s30 = sld [smem:[#allocation7 + $0x1d]] }
  0x6d   :  { %2847 = vmatprep.subr.bf16.mxu1 %v3026_v29  ;;  %v3037_v29 = vld [vmem:[#allocation2 + $0x168] sm:$0xff]   ;;  %v3076_v12 = vld [vmem:[#allocation2 + $0x2a0] sm:$0xff]   ;;  %s3430_s10 = sld [smem:[#allocation8 + $0x5]] }
  0x6e   :  { %s2695_s5 = sld [smem:[#allocation7 + $0x6]] }
  0x6f   :  { %2826 = vmatpush3.bf16.msra.mxu0 %v3027_v30  ;;  %v352_v30 = vpack.c.bf16 %v350_v27, %v350_v27  ;;  %v3058_v27 = vld [vmem:[#allocation2 + $0x1c0] sm:$0xff]   ;;  %s3445_s11 = sld [smem:[#allocation7 + $0xe]] }
  0x70   :  { %2848 = vmatpush3.bf16.msra.mxu1 %v3028_v31  ;;  %2855 = vmatprep.subr.bf16.mxu0 %v3029_v36  ;;  %v351_v31 = vpack.c.bf16 %v349_v26, %v349_v26  ;;  %v3032_v36 = vld [vmem:[#allocation2 + $0x1b8] sm:$0xff]   ;;  %v728_v26 = vmul.f32 %v726_v19, %v3327_v35  ;;  %v3082_v19 = vld [vmem:[#allocation2 + $0x2d0] sm:$0xff]   ;;  %s3447_s3 = sld [smem:[#allocation7 + $0x16]] }
  0x71   :  { %2877 = vmatprep.subr.bf16.mxu1 %v3030_v37  ;;  %v3034_v37 = vld [vmem:[#allocation2 + $0x1f0] sm:$0xff]   ;;  %513 = vmatprep.mubr.bf16.mxu1 %v352_v30  ;;  %v738_v30 = vstv %s3385_s21  ;;  %s3449_s7 = sld [smem:[#allocation7 + $0x1e]] }
  0x72   :  { %309 = vmatmul.mubr.bf16.vlgmr.msra.gmra.mxu0 %v146_v21  ;;  %v3061_v21 = vld [vmem:[#allocation2 + $0x278] sm:$0xff]   ;;  %s3451_s12 = sld [smem:[#allocation8 + $0x6]] }
  0x73   :  { %2856 = vmatpush3.bf16.msra.mxu0 %v3031_v22  ;;  %514 = vmatmul.mubr.bf16.vlgmr.msra.gmra.mxu1 %v351_v31  ;;  %v3056_v22 = vld [vmem:[#allocation2 + $0x188] sm:$0xff]   ;;  %s3453_s13 = sld [smem:[#allocation7 + $0x7]] }
  0x74   :  { %2857 = vmatprep.subr.bf16.mxu0 %v3033_v23  ;;  %2878 = vmatpush3.bf16.msra.mxu1 %v3032_v36  ;;  %v542_v23 = vadd.f32 %v540_v10, %v536_v14  ;;  %v547_v36 = vadd.f32 %v545_v18, %v543_v24  ;;  %v3072_v10 = vld [vmem:[#allocation2 + $0x2a8] sm:$0xff]   ;;  %v3081_v14 = vld [vmem:[#allocation2 + $0x250] sm:$0xff]   ;;  %s3455_s14 = sld [smem:[#allocation7 + $0xf]] }
  0x75   :  { %2879 = vmatprep.subr.bf16.mxu1 %v3034_v37  ;;  %v729_v37 = vadd.f32 %v727_v25, %v723_v16  ;;  %v3083_v16 = vld [vmem:[#allocation2 + $0x210] sm:$0xff]   ;;  %s3464_s17 = sld [smem:[#allocation7 + $0x17]] }
  0x76   :  { %v546_v31 = vadd.f32 %v545_v18, %v542_v23  ;;  %v921_v18 = vstv %s2653_s23  ;;  %v925_v23 = vstv %s2654_s24  ;;  %s3563_s15 = sld [smem:[#allocation10 + $0x8]] }
  0x77   :  { %2858 = vmatpush3.bf16.msra.mxu0 %v3035_v28  ;;  %v733_v28 = vmul.f32 %v732_v20, %v3332_v38  ;;  %v926_v24 = vmul.f32 %v925_v23, %v3322_v34  ;;  %v927_v25 = vmul.f32 %v925_v23, %v3327_v35  ;;  %v3105_v23 = vld [vmem:[#allocation2 + $0x360] sm:$0xff]   ;;  %s3565_s8 = sld [smem:[#allocation10 + $0x9]] }
  0x78   :  { %2859 = vmatprep.subr.bf16.mxu0 %v3037_v29  ;;  %2880 = vmatpush3.bf16.msra.mxu1 %v3036_v44  ;;  %v734_v29 = vmul.f32 %v732_v20, %v3337_v39  ;;  %v740_v44 = vmul.f32 %v738_v30, %v3349_v41  ;;  %v3085_v20 = vld [vmem:[#allocation2 + $0x248] sm:$0xff]   ;;  %s3567_s16 = sld [smem:[#allocation10 + $0xa]] }
  0x79   :  { %2881 = vmatprep.subr.bf16.mxu1 %v3038_v45  ;;  %v3060_v45 = vld [vmem:[#allocation2 + $0x180] sm:$0xff]   ;;  %s3569_s6 = sld [smem:[#allocation10 + $0xb]] }
  0x7a   :  { %s3573_s18 = sld [smem:[#allocation10 + $0xd]] }
  0x7b   :  { %2860 = vmatpush3.bf16.msra.mxu0 %v3039_v42  ;;  %v730_v42 = vadd.f32 %v728_v26, %v724_v17  ;;  %v3080_v17 = vld [vmem:[#allocation2 + $0x298] sm:$0xff]   ;;  %v931_v26 = vstv %s2655_s25  ;;  %s3575_s19 = sld [smem:[#allocation10 + $0xe]] }
  0x7c   :  { %2861 = vmatprep.subr.bf16.mxu0 %v3041_v43  ;;  %2882 = vmatpush3.bf16.msra.mxu1 %v3040_v48  ;;  %v739_v43 = vmul.f32 %v738_v30, %v3344_v40  ;;  %v735_v48 = vadd.f32 %v733_v28, %v729_v37  ;;  %v932_v28 = vmul.f32 %v931_v26, %v3332_v38  ;;  %v937_v30 = vstv %s3408_s26  ;;  %s3577_s20 = sld [smem:[#allocation10 + $0xf]] }
  0x7d   :  { %2883 = vmatprep.subr.bf16.mxu1 %v3042_v49  ;;  %v736_v49 = vadd.f32 %v734_v29, %v730_v42  ;;  %v933_v29 = vmul.f32 %v931_v26, %v3337_v39  ;;  %v938_v42 = vmul.f32 %v937_v30, %v3344_v40  ;;  %v3107_v26 = vld [vmem:[#allocation2 + $0x320] sm:$0xff]   ;;  %3969 = sst [smem:[#allocation19_spill]] %s3565_s8 }
  0x7e   :  { %3970 = sst [smem:[#allocation20_spill]] %s3567_s16 }
  0x7f   :  { %2862 = vmatpush3.bf16.msra.mxu0 %v3043_v46  ;;  %v548_v46 = vmax.f32 %v546_v31, 0.0  ;;  %v3089_v31 = vld [vmem:[#allocation2 + $0x240] sm:$0xff]   ;;  %3971 = sst [smem:[#allocation21_spill]] %s3569_s6 }
  0x80   :  { %2863 = vmatprep.subr.bf16.mxu0 %v3045_v47  ;;  %2884 = vmatpush3.bf16.msra.mxu1 %v3044_v50  ;;  %v549_v47 = vmax.f32 %v547_v36, 0.0  ;;  %v3062_v50 = vld [vmem:[#allocation2 + $0x2f8] sm:$0xff]   ;;  %3973 = sst [smem:[#allocation23_spill]] %s3573_s18 }
  0x81   :  { %2885 = vmatprep.subr.bf16.mxu1 %v3046_v53  ;;  %v741_v53 = vadd.f32 %v739_v43, %v735_v48  ;;  %v939_v43 = vmul.f32 %v937_v30, %v3349_v41  ;;  %v3111_v30 = vld [vmem:[#allocation2 + $0x318] sm:$0xff]   ;;  %3974 = sst [smem:[#allocation24_spill]] %s3575_s19 }
  0x82   :  { %3975 = sst [smem:[#allocation25_spill]] %s3577_s20 }
  0x83   :  { %2864 = vmatpush3.bf16.msra.mxu0 %v3047_v51  ;;  %v744_v51 = vstv %s3393_s22  ;;  %s3473_s22 = sld [smem:[#allocation7 + $0x1f]] }
  0x84   :  { %2865 = vmatprep.subr.bf16.mxu0 %v3049_v52  ;;  %2886 = vmatpush3.bf16.msra.mxu1 %v3048_v55  ;;  %v551_v52 = vpack.c.bf16 %v549_v47, %v549_v47  ;;  %v550_v55 = vpack.c.bf16 %v548_v46, %v548_v46  ;;  %s3579_s21 = sld [smem:[#allocation10 + $0x10]] }
  0x85   :  { %2887 = vmatprep.subr.bf16.mxu1 %v3050_v58  ;;  %v745_v58 = vadd.f32 %v744_v51, %v741_v53  ;;  %v1130_v53 = vstv %s3418_s29  ;;  %s3583_s23 = sld [smem:[#allocation10 + $0x12]] }
  0x86   :  { %712 = vmatprep.mubr.bf16.mxu0 %v551_v52  ;;  %v1124_v52 = vstv %s3414_s1  ;;  %s3585_s24 = sld [smem:[#allocation10 + $0x13]] }
  0x87   :  { %2866 = vmatpush3.bf16.msra.mxu0 %v3051_v54  ;;  %v742_v54 = vadd.f32 %v740_v44, %v736_v49  ;;  %v747_v60 = vmax.f32 %v745_v58, 0.0  ;;  %v1120_v44 = vstv %s3412_s28  ;;  %v1126_v58 = vmul.f32 %v1124_v52, %v3327_v35  ;;  %s3587_s25 = sld [smem:[#allocation10 + $0x14]] }
  0x88   :  { %2867 = vmatprep.subr.bf16.mxu0 %v3053_v56  ;;  %2888 = vmatpush3.bf16.msra.mxu1 %v3052_v63  ;;  %v3063_v56 = vld [vmem:[#allocation2 + $0x238] sm:$0xff]   ;;  %v3069_v63 = vld [vmem:[#allocation2 + $0x268] sm:$0xff]   ;;  %v1121_v48 = vmul.f32 %v1120_v44, %v3312_v32  ;;  %v1122_v49 = vmul.f32 %v1120_v44, %v3317_v33  ;;  %s3589_s26 = sld [smem:[#allocation10 + $0x15]] }
  0x89   :  { %2889 = vmatprep.subr.bf16.mxu1 %v3054_v7  ;;  %v749_v1 = vpack.c.bf16 %v747_v60, %v747_v60  ;;  %v3070_v7 = vld [vmem:[#allocation2 + $0x2e8] sm:$0xff]   ;;  %v1136_v60 = vstv %s3422_s30  ;;  %s3489_s30 = sld [smem:[#allocation8 + $0x7]] }
  0x8a   :  { %v1138_v35 = vmul.f32 %v1136_v60, %v3349_v41  ;;  %v3117_v44 = vld [vmem:[#allocation2 + $0x348] sm:$0xff]   ;;  %s3593_s28 = sld [smem:[#allocation10 + $0x17]] }
  0x8b   :  { %2868 = vmatpush3.bf16.msra.mxu0 %v3055_v59  ;;  %v746_v59 = vadd.f32 %v744_v51, %v742_v54  ;;  %v943_v51 = vstv %s3410_s27  ;;  %v3091_v54 = vld [vmem:[#allocation2 + $0x200] sm:$0xff]   ;;  %s3591_s27 = sld [smem:[#allocation10 + $0x16]] }
  0x8c   :  { %2869 = vmatprep.subr.bf16.mxu0 %v3057_v3  ;;  %2890 = vmatpush3.bf16.msra.mxu1 %v3056_v22  ;;  %v3066_v3 = vld [vmem:[#allocation2 + $0x2f0] sm:$0xff]   ;;  %v923_v22 = vmul.f32 %v921_v18, %v3317_v33  ;;  %v3093_v33 = vld [vmem:[#allocation2 + $0x378] sm:$0xff]   ;;  %s3595_s1 = sld [smem:[#allocation10 + $0x18]] }
  0x8d   :  { %2891 = vmatprep.subr.bf16.mxu1 %v3058_v27  ;;  %v748_v61 = vmax.f32 %v746_v59, 0.0  ;;  %v3087_v27 = vld [vmem:[#allocation2 + $0x208] sm:$0xff]   ;;  %v1131_v59 = vmul.f32 %v1130_v53, %v3332_v38  ;;  %s3601_s29 = sld [smem:[#allocation10 + $0x19]] }
  0x8e   :  { %v929_v37 = vadd.f32 %v927_v25, %v923_v22  ;;  %v3103_v22 = vld [vmem:[#allocation2 + $0x328] sm:$0xff]   ;;  %3976 = sst [smem:[#allocation26_spill]] %s3589_s26 }
  0x8f   :  { %2870 = vmatpush3.bf16.msra.mxu0 %v3059_v13  ;;  %v750_v0 = vpack.c.bf16 %v748_v61, %v748_v61  ;;  %v3079_v13 = vld [vmem:[#allocation2 + $0x218] sm:$0xff]   ;;  %v3088_v61 = vld [vmem:[#allocation2 + $0x288] sm:$0xff]   ;;  %s3637_s9 = sld [smem:[#allocation10 + $0x1d]] }
  0x90   :  { %2899 = vmatprep.subr.bf16.mxu0 %v3061_v21  ;;  %2892 = vmatpush3.bf16.msra.mxu1 %v3060_v45  ;;  %v922_v21 = vmul.f32 %v921_v18, %v3312_v32  ;;  %v3084_v45 = vld [vmem:[#allocation2 + $0x290] sm:$0xff]   ;;  %v935_v47 = vadd.f32 %v933_v29, %v929_v37  ;;  %v1132_v32 = vmul.f32 %v1130_v53, %v3337_v39  ;;  %v3102_v25 = vld [vmem:[#allocation2 + $0x3e8] sm:$0xff]   ;;  %v3106_v29 = vld [vmem:[#allocation2 + $0x3e0] sm:$0xff]   ;;  %3978 = sst [smem:[#allocation28_spill]] %s3593_s28 }
  0x91   :  { %2921 = vmatprep.subr.bf16.mxu1 %v3062_v50  ;;  %911 = vmatprep.mubr.bf16.mxu1 %v750_v0  ;;  %v3086_v50 = vld [vmem:[#allocation2 + $0x2c8] sm:$0xff]   ;;  %v3110_v37 = vld [vmem:[#allocation2 + $0x3d8] sm:$0xff]   ;;  %3977 = sst [smem:[#allocation27_spill]] %s3591_s27 }
  0x92   :  { %713 = vmatmul.mubr.bf16.vlgmr.msra.gmra.mxu0 %v550_v55  ;;  %v928_v36 = vadd.f32 %v926_v24, %v922_v21  ;;  %v3098_v21 = vld [vmem:[#allocation2 + $0x3f0] sm:$0xff]   ;;  %v3128_v53 = vld [vmem:[%s3935_s0 + $0x18] sm:$0xff]  ;;  %3979 = sst [smem:[#allocation29_spill]] %s3595_s1 }
  0x93   :  { %2900 = vmatpush3.bf16.msra.mxu0 %v3063_v56  ;;  %912 = vmatmul.mubr.bf16.vlgmr.msra.gmra.mxu1 %v749_v1  ;;  %v941_v56 = vadd.f32 %v939_v43, %v935_v47  ;;  %v1128_v1 = vadd.f32 %v1126_v58, %v1122_v49  ;;  %v3100_v24 = vld [vmem:[#allocation2 + $0x3b0] sm:$0xff]   ;;  %v1319_v43 = vstv %s2695_s5  ;;  %v3126_v47 = vld [vmem:[%s3935_s0 + $0x8] sm:$0xff]  ;;  %v1323_v49 = vstv %s3445_s11  ;;  %s3549_s5 = sld [smem:[#allocation10 + $0x1]] }
  0x94   :  { %2901 = vmatprep.subr.bf16.mxu0 %v3065_v57  ;;  %2922 = vmatpush3.bf16.msra.mxu1 %v3064_v2  ;;  %v934_v46 = vadd.f32 %v932_v28, %v928_v36  ;;  %v1125_v57 = vmul.f32 %v1124_v52, %v3322_v34  ;;  %v3090_v2 = vld [vmem:[#allocation2 + $0x2c0] sm:$0xff]   ;;  %v1137_v34 = vmul.f32 %v1136_v60, %v3344_v40  ;;  %v3104_v28 = vld [vmem:[#allocation2 + $0x3a8] sm:$0xff]   ;;  %v1335_v60 = vstv %s3449_s7  ;;  %s3551_s11 = sld [smem:[#allocation10 + $0x2]] }
  0x95   :  { %2923 = vmatprep.subr.bf16.mxu1 %v3066_v3  ;;  %v3092_v3 = vld [vmem:[#allocation2 + $0x280] sm:$0xff]   ;;  %s3555_s7 = sld [smem:[#allocation10 + $0x4]] }
  0x96   :  { %v940_v55 = vadd.f32 %v938_v42, %v934_v46  ;;  %v1127_v0 = vadd.f32 %v1125_v57, %v1121_v48  ;;  %v3108_v36 = vld [vmem:[#allocation2 + $0x3a0] sm:$0xff]   ;;  %v3115_v42 = vld [vmem:[#allocation2 + $0x310] sm:$0xff]   ;;  %v1321_v48 = vmul.f32 %v3126_v47, %v1319_v43  ;;  %3980 = sst [smem:[#allocation30_spill]] %s3601_s29 }
  0x97   :  { %2902 = vmatpush3.bf16.msra.mxu0 %v3067_v62  ;;  %v3129_v57 = vld [vmem:[%s3935_s0 + $0x20] sm:$0xff]  ;;  %s3613_s1 = sld [smem:[#allocation10 + $0x1a]] }
  0x98   :  { %2903 = vmatprep.subr.bf16.mxu0 %v3069_v63  ;;  %2924 = vmatpush3.bf16.msra.mxu1 %v3068_v6  ;;  %v944_v62 = vadd.f32 %v943_v51, %v940_v55  ;;  %v945_v63 = vadd.f32 %v943_v51, %v941_v56  ;;  %v1133_v39 = vadd.f32 %v1131_v59, %v1127_v0  ;;  %v1142_v6 = vstv %s3430_s10  ;;  %v3127_v51 = vld [vmem:[%s3935_s0 + $0x10] sm:$0xff]  ;;  %v3130_v59 = vld [vmem:[%s3935_s0 + $0x28] sm:$0xff]  ;;  %s3615_s28 = sld [smem:[#allocation10 + $0x1b]] }
  0x99   :  { %2925 = vmatprep.subr.bf16.mxu1 %v3070_v7  ;;  %v3094_v7 = vld [vmem:[#allocation2 + $0x3f8] sm:$0xff]   ;;  %v1324_v52 = vmul.f32 %v3127_v51, %v1323_v49  ;;  %v1329_v55 = vstv %s3447_s3  ;;  %v3114_v56 = vld [vmem:[#allocation2 + $0x3d0] sm:$0xff]   ;;  %s3553_s3 = sld [smem:[#allocation10 + $0x3]] }
  0x9a   :  { %v946_v38 = vmax.f32 %v944_v62, 0.0  ;;  %v1330_v58 = vmul.f32 %v3129_v57, %v1329_v55  ;;  %s3627_s29 = sld [smem:[#allocation10 + $0x1c]] }
  0x9b   :  { %2904 = vmatpush3.bf16.msra.mxu0 %v3071_v4  ;;  %v947_v4 = vmax.f32 %v945_v63, 0.0  ;;  %v3131_v63 = vld [vmem:[%s3935_s0 + $0x30] sm:$0xff]  ;;  %s3643_s26 = sld [smem:[#allocation10 + $0x1e]] }
  0x9c   :  { %2905 = vmatprep.subr.bf16.mxu0 %v3073_v5  ;;  %2926 = vmatpush3.bf16.msra.mxu1 %v3072_v10  ;;  %v1134_v5 = vadd.f32 %v1132_v32, %v1128_v1  ;;  %v1331_v32 = vmul.f32 %v3130_v59, %v1329_v55  ;;  %v1336_v0 = vmul.f32 %v3131_v63, %v1335_v60  ;;  %v3132_v1 = vld [vmem:[%s3935_s0 + $0x38] sm:$0xff]  ;;  %s3669_s27 = sld [smem:[#allocation11]] }
  0x9d   :  { %2927 = vmatprep.subr.bf16.mxu1 %v3074_v11  ;;  %v948_v11 = vpack.c.bf16 %v946_v38, %v946_v38  ;;  %s3675_s10 = sld [smem:[#allocation11 + $0x1]] }
  0x9e   :  { %v1140_v10 = vadd.f32 %v1138_v35, %v1134_v5  ;;  %v1518_v35 = vstv %s3453_s13  ;;  %s3559_s13 = sld [smem:[#allocation10 + $0x6]] }
  0x9f   :  { %2906 = vmatpush3.bf16.msra.mxu0 %v3075_v8  ;;  %v949_v8 = vpack.c.bf16 %v947_v4, %v947_v4  ;;  %v1520_v5 = vmul.f32 %v3126_v47, %v1518_v35 }
  0xa0   :  { %2907 = vmatprep.subr.bf16.mxu0 %v3077_v9  ;;  %2928 = vmatpush3.bf16.msra.mxu1 %v3076_v12  ;;  %v1139_v9 = vadd.f32 %v1137_v34, %v1133_v39  ;;  %v3095_v12 = vld [vmem:[#allocation2 + $0x338] sm:$0xff]   ;;  %v1144_v41 = vadd.f32 %v1142_v6, %v1140_v10  ;;  %v3121_v34 = vld [vmem:[#allocation2 + $0x340] sm:$0xff]  }
  0xa1   :  { %2929 = vmatprep.subr.bf16.mxu1 %v3078_v15  ;;  %1110 = vmatprep.mubr.bf16.mxu0 %v949_v8  ;;  %v1522_v8 = vstv %s3455_s14  ;;  %v3123_v10 = vld [vmem:[#allocation2 + $0x300] sm:$0xff]   ;;  %s3561_s14 = sld [smem:[#allocation10 + $0x7]] }
  0xa2   :  { %v1143_v40 = vadd.f32 %v1142_v6, %v1139_v9  ;;  %v1146_v15 = vmax.f32 %v1144_v41, 0.0  ;;  %v3118_v6 = vld [vmem:[#allocation2 + $0x3c8] sm:$0xff]   ;;  %v1528_v9 = vstv %s3464_s17  ;;  %s3571_s17 = sld [smem:[#allocation10 + $0xc]] }
  0xa3   :  { %2908 = vmatpush3.bf16.msra.mxu0 %v3079_v13  ;;  %v3097_v13 = vld [vmem:[#allocation2 + $0x370] sm:$0xff]   ;;  %v1529_v41 = vmul.f32 %v3129_v57, %v1528_v9  ;;  %v1718_v57 = vld [vmem:[#allocation5 + $0x40] sm:$0xff] }
  0xa4   :  { %2909 = vmatprep.subr.bf16.mxu0 %v3081_v14  ;;  %2930 = vmatpush3.bf16.msra.mxu1 %v3080_v17  ;;  %v1145_v14 = vmax.f32 %v1143_v40, 0.0  ;;  %v3101_v17 = vld [vmem:[#allocation2 + $0x368] sm:$0xff]   ;;  %v1148_v18 = vpack.c.bf16 %v1146_v15, %v1146_v15  ;;  %v1524_v40 = vmul.f32 %v3128_v53, %v1522_v8  ;;  %v1534_v15 = vstv %s3473_s22  ;;  %s3581_s22 = sld [smem:[#allocation10 + $0x11]] }
  0xa5   :  { %2931 = vmatprep.subr.bf16.mxu1 %v3082_v19 }
  0xa6   :  { %v1147_v19 = vpack.c.bf16 %v1145_v14, %v1145_v14  ;;  %1309 = vmatprep.mubr.bf16.mxu1 %v1148_v18  ;;  %v1530_v14 = vmul.f32 %v3130_v59, %v1528_v9 }
  0xa7   :  { %2910 = vmatpush3.bf16.msra.mxu0 %v3083_v16  ;;  %v3099_v16 = vld [vmem:[#allocation2 + $0x330] sm:$0xff]  }
  0xa8   :  { %2911 = vmatprep.subr.bf16.mxu0 %v3085_v20  ;;  %2932 = vmatpush3.bf16.msra.mxu1 %v3084_v45  ;;  %v3096_v20 = vld [vmem:[#allocation2 + $0x3b8] sm:$0xff]   ;;  %v3125_v45 = vld [vmem:[%s3935_s0] sm:$0xff]  ;;  %3972 = sst [smem:[#allocation22_spill]] %s3571_s17 }
  0xa9   :  { %2933 = vmatprep.subr.bf16.mxu1 %v3086_v50  ;;  %v1320_v46 = vmul.f32 %v3125_v45, %v1319_v43  ;;  %v3112_v50 = vld [vmem:[#allocation2 + $0x398] sm:$0xff]   ;;  %v1519_v39 = vmul.f32 %v3125_v45, %v1518_v35  ;;  %v3240_v35 = vmov 0   ;;  %s3981_s0 = sld [smem:[#allocation26_spill]] }
  0xab   :  { %2912 = vmatpush3.bf16.msra.mxu0 %v3087_v27  ;;  %v3109_v27 = vld [vmem:[#allocation2 + $0x358] sm:$0xff]  }
  0xac   :  { %2913 = vmatprep.subr.bf16.mxu0 %v3089_v31  ;;  %2934 = vmatpush3.bf16.msra.mxu1 %v3088_v61  ;;  %v3113_v31 = vld [vmem:[#allocation2 + $0x350] sm:$0xff]   ;;  %v1326_v61 = vadd.f32 %v1324_v52, %v1320_v46  ;;  %v1819_v52 = vld [vmem:[#allocation5 + $0xc8] sm:$0xff] }
  0xad   :  { %2935 = vmatprep.subr.bf16.mxu1 %v3090_v2  ;;  %v1337_v2 = vmul.f32 %v3132_v1, %v1335_v60 }
  0xae   :  { %v1332_v38 = vadd.f32 %v1330_v58, %v1326_v61  ;;  %v1816_v58 = vld [vmem:[#allocation5 + $0x8] sm:$0xff] }
  0xaf   :  { %2914 = vmatpush3.bf16.msra.mxu0 %v3091_v54  ;;  %v1325_v54 = vmul.f32 %v3128_v53, %v1323_v49  ;;  %v1720_v49 = vld [vmem:[#allocation5 + $0xc0] sm:$0xff] }
  0xb0   :  { %2943 = vmatprep.subr.bf16.mxu0 %v3093_v33  ;;  %2936 = vmatpush3.bf16.msra.mxu1 %v3092_v3  ;;  %v3119_v33 = vld [vmem:[#allocation2 + $0x308] sm:$0xff]   ;;  %v3116_v3 = vld [vmem:[#allocation2 + $0x390] sm:$0xff]  }
  0xb1   :  { %2965 = vmatprep.subr.bf16.mxu1 %v3094_v7  ;;  %v1327_v62 = vadd.f32 %v1325_v54, %v1321_v48  ;;  %v1341_v7 = vstv %s3451_s12  ;;  %v1719_v48 = vld [vmem:[#allocation5 + $0x80] sm:$0xff]  ;;  %s3557_s12 = sld [smem:[#allocation10 + $0x5]] }
  0xb2   :  { %1111 = vmatmul.mubr.bf16.vlgmr.msra.gmra.mxu0 %v948_v11  ;;  %v1338_v11 = vadd.f32 %v1336_v0, %v1332_v38  ;;  %v2739_v53 = vcombine.low %v1719_v48, %v1720_v49 }
  0xb3   :  { %2944 = vmatpush3.bf16.msra.mxu0 %v3095_v12  ;;  %1310 = vmatmul.mubr.bf16.vlgmr.msra.gmra.mxu1 %v1147_v19  ;;  %v1333_v4 = vadd.f32 %v1331_v32, %v1327_v62  ;;  %v1817_v32 = vld [vmem:[#allocation5 + $0x48] sm:$0xff]  ;;  %v3496_v62 = vld [vmem:[#allocation5 + $0x90] sm:$0xff] }
  0xb4   :  { %2945 = vmatprep.subr.bf16.mxu0 %v3097_v13  ;;  %2966 = vmatpush3.bf16.msra.mxu1 %v3096_v20  ;;  %v1523_v13 = vmul.f32 %v3127_v51, %v1522_v8  ;;  %v1526_v20 = vadd.f32 %v1524_v40, %v1520_v5  ;;  %v2740_v51 = vcombine.high %v1719_v48, %v1720_v49 }
  0xb5   :  { %2967 = vmatprep.subr.bf16.mxu1 %v3098_v21  ;;  %v1339_v12 = vadd.f32 %v1337_v2, %v1333_v4  ;;  %v3122_v21 = vld [vmem:[#allocation2 + $0x3c0] sm:$0xff]   ;;  %v2746_v61 = vcombine.high %v1816_v58, %v1817_v32  ;;  %v3504_v2 = vld [vmem:[#allocation5 + $0x98] sm:$0xff] }
  0xb6   :  { %v1525_v19 = vadd.f32 %v1523_v13, %v1519_v39 }
  0xb7   :  { %2946 = vmatpush3.bf16.msra.mxu0 %v3099_v16  ;;  %v3120_v16 = vld [vmem:[#allocation2 + $0x388] sm:$0xff]   ;;  %v1343_v18 = vadd.f32 %v1341_v7, %v1339_v12  ;;  %3968 = sst [smem:[#allocation18_spill]] %s3557_s12 }
  0xb8   :  { %2947 = vmatprep.subr.bf16.mxu0 %v3101_v17  ;;  %2968 = vmatpush3.bf16.msra.mxu1 %v3100_v24  ;;  %v1342_v17 = vadd.f32 %v1341_v7, %v1338_v11 }
  0xb9   :  { %2969 = vmatprep.subr.bf16.mxu1 %v3102_v25  ;;  %v1345_v25 = vmax.f32 %v1343_v18, 0.0 }
  0xba   :  { %v1344_v24 = vmax.f32 %v1342_v17, 0.0 }
  0xbb   :  { %2948 = vmatpush3.bf16.msra.mxu0 %v3103_v22  ;;  %v1535_v22 = vmul.f32 %v3131_v63, %v1534_v15  ;;  %v3498_v63 = vld [vmem:[#allocation5 + $0xd0] sm:$0xff] }
  0xbc   :  { %2949 = vmatprep.subr.bf16.mxu0 %v3105_v23  ;;  %2970 = vmatpush3.bf16.msra.mxu1 %v3104_v28  ;;  %v1536_v23 = vmul.f32 %v3132_v1, %v1534_v15  ;;  %v1540_v28 = vstv %s3489_s30  ;;  %v2756_v0 = vcombine.low %v3496_v62, %v3498_v63  ;;  %v2757_v1 = vcombine.high %v3496_v62, %v3498_v63  ;;  %s3656_s30 = sld [smem:[#allocation10 + $0x1f]] }
  0xbd   :  { %2971 = vmatprep.subr.bf16.mxu1 %v3106_v29  ;;  %v3124_v29 = vld [vmem:[#allocation2 + $0x380] sm:$0xff]  }
  0xbf   :  { %2950 = vmatpush3.bf16.msra.mxu0 %v3107_v26  ;;  %v1531_v26 = vadd.f32 %v1529_v41, %v1525_v19 }
  0xc0   :  { %2951 = vmatprep.subr.bf16.mxu0 %v3109_v27  ;;  %2972 = vmatpush3.bf16.msra.mxu1 %v3108_v36  ;;  %v1532_v27 = vadd.f32 %v1530_v14, %v1526_v20 }
  0xc1   :  { %2973 = vmatprep.subr.bf16.mxu1 %v3110_v37  ;;  %v1346_v37 = vpack.c.bf16 %v1344_v24, %v1344_v24 }
  0xc2   :  { %v1538_v36 = vadd.f32 %v1536_v23, %v1532_v27 }
  0xc3   :  { %2952 = vmatpush3.bf16.msra.mxu0 %v3111_v30  ;;  %v1347_v30 = vpack.c.bf16 %v1345_v25, %v1345_v25 }
  0xc4   :  { %2953 = vmatprep.subr.bf16.mxu0 %v3113_v31  ;;  %2974 = vmatpush3.bf16.msra.mxu1 %v3112_v50  ;;  %v1537_v31 = vadd.f32 %v1535_v22, %v1531_v26  ;;  %v1542_v43 = vadd.f32 %v1540_v28, %v1538_v36  ;;  %v1818_v50 = vld [vmem:[#allocation5 + $0x88] sm:$0xff] }
  0xc5   :  { %2975 = vmatprep.subr.bf16.mxu1 %v3114_v56  ;;  %1508 = vmatprep.mubr.bf16.mxu0 %v1347_v30  ;;  %v2747_v54 = vcombine.low %v1818_v50, %v1819_v52  ;;  %v2748_v55 = vcombine.high %v1818_v50, %v1819_v52  ;;  %v1717_v56 = vld [vmem:[#allocation5] sm:$0xff] }
  0xc6   :  { %v1544_v45 = vmax.f32 %v1542_v43, 0.0  ;;  %v2738_v59 = vcombine.high %v1717_v56, %v1718_v57  ;;  %v2737_v60 = vcombine.low %v1717_v56, %v1718_v57  ;;  %v1920_v57 = vld [vmem:[#allocation5 + $0x50] sm:$0xff] }
  0xc7   :  { %2954 = vmatpush3.bf16.msra.mxu0 %v3115_v42  ;;  %v1541_v42 = vadd.f32 %v1540_v28, %v1537_v31 }
  0xc8   :  { %2955 = vmatprep.subr.bf16.mxu0 %v3117_v44  ;;  %2976 = vmatpush3.bf16.msra.mxu1 %v3116_v3  ;;  %v1546_v46 = vpack.c.bf16 %v1544_v45, %v1544_v45 }
  0xc9   :  { %2977 = vmatprep.subr.bf16.mxu1 %v3118_v6  ;;  %v1543_v44 = vmax.f32 %v1541_v42, 0.0  ;;  %v2589_v6 = vld [vmem:[%s3937_s2] ss:$0 sm:$0xff]  ;;  %s3547_s2 = sld [smem:[#allocation10]] }
  0xca   :  { %1707 = vmatprep.mubr.bf16.mxu1 %v1546_v46 }
  0xcb   :  { %2956 = vmatpush3.bf16.msra.mxu0 %v3119_v33  ;;  %v1545_v47 = vpack.c.bf16 %v1543_v44, %v1543_v44  ;;  %v2745_v33 = vcombine.low %v1816_v58, %v1817_v32  ;;  %v2022_v58 = vld [vmem:[#allocation5 + $0x18] sm:$0xff] }
  0xcc   :  { %2957 = vmatprep.subr.bf16.mxu0 %v3121_v34  ;;  %2978 = vmatpush3.bf16.msra.mxu1 %v3120_v16  ;;  %v3506_v34 = vld [vmem:[#allocation5 + $0xd8] sm:$0xff] }
  0xcd   :  { %2979 = vmatprep.subr.bf16.mxu1 %v3122_v21  ;;  %v2766_v3 = vcombine.high %v3504_v2, %v3506_v34  ;;  %v2765_v38 = vcombine.low %v3504_v2, %v3506_v34  ;;  %v2333_v34 = vld [vmem:[#allocation5 + $0xb0] sm:$0xff] }
  0xcf   :  { %2958 = vmatpush3.bf16.msra.mxu0 %v3123_v10 }
  0xd0   :  { %2980 = vmatpush3.bf16.msra.mxu1 %v3124_v29  ;;  %1769 = vmatprep.subr.bf16.mxu0 %v2740_v51 }
  0xd1   :  { %1864 = vmatprep.subr.bf16.mxu1 %v2748_v55  ;;  %v1919_v55 = vld [vmem:[#allocation5 + $0x10] sm:$0xff] }
  0xd2   :  { %1509 = vmatmul.mubr.bf16.vlgmr.msra.gmra.mxu0 %v1346_v37 }
  0xd3   :  { %1708 = vmatmul.mubr.bf16.vlgmr.msra.gmra.mxu1 %v1545_v47  ;;  %1770 = vmatpush1.bf16.msra.mxu0 %v2739_v53 }
  0xd4   :  { %1865 = vmatpush1.bf16.msra.mxu1 %v2747_v54  ;;  %1771 = vmatprep.subr.bf16.mxu0 %v2738_v59  ;;  %v2023_v59 = vld [vmem:[#allocation5 + $0x58] sm:$0xff] }
  0xd5   :  { %1866 = vmatprep.subr.bf16.mxu1 %v2746_v61  ;;  %1789 = vmatprep.mubr.bf16.mxu0 %v3240_v35  ;;  %v2755_v61 = vcombine.high %v1919_v55, %v1920_v57 }
  0xd6   :  { %1884 = vmatprep.mubr.bf16.mxu1 %v3240_v35 }
  0xd7   :  { %1772 = vmatpush1.bf16.msra.mxu0 %v2737_v60 }
  0xd8   :  { %1867 = vmatpush1.bf16.msra.mxu1 %v2745_v33  ;;  %1967 = vmatprep.subr.bf16.mxu0 %v2757_v1  ;;  %v2764_v1 = vcombine.high %v2022_v58, %v2023_v59 }
  0xd9   :  { %2070 = vmatprep.subr.bf16.mxu1 %v2766_v3  ;;  %v2127_v3 = vld [vmem:[#allocation5 + $0xa0] sm:$0xff] }
 0x132   :  { %v2827_v4 = vpop.f32.mrf.mxu0 }
 0x133   :  { %v2849_v8 = vpop.f32.mrf.mxu1 }
 0x134   :  { %v2828_v39 = vpop.f32.mrf.mxu0 }
 0x135   :  { %v2829_v5 = vadd.f32 %v2828_v39, %v2827_v4  ;;  %v2850_v11 = vpop.f32.mrf.mxu1  ;;  %v2128_v4 = vld [vmem:[#allocation5 + $0xe0] sm:$0xff]  ;;  %v2230_v39 = vld [vmem:[#allocation5 + $0xa8] sm:$0xff] }
 0x136   :  { %v2830_v7 = vpop.f32.mrf.mxu0  ;;  %v2851_v12 = vadd.f32 %v2850_v11, %v2849_v8  ;;  %v2775_v8 = vcombine.high %v2127_v3, %v2128_v4  ;;  %v2126_v11 = vld [vmem:[#allocation5 + $0x60] sm:$0xff]  ;;  %v2774_v62 = vcombine.low %v2127_v3, %v2128_v4  ;;  %v2102_v3 = vstv %s3571_s17  ;;  %s3984_s17 = sld [smem:[#allocation29_spill]] }
 0x137   :  { %v322_v10 = vadd.f32 %v2829_v5, %v2589_v6  ;;  %v2852_v13 = vpop.f32.mrf.mxu1  ;;  %v2231_v5 = vld [vmem:[#allocation5 + $0xe8] sm:$0xff]  ;;  %v2754_v6 = vcombine.low %v1919_v55, %v1920_v57  ;;  %v2763_v7 = vcombine.low %v2022_v58, %v2023_v59  ;;  %v1914_v57 = vstv %s3561_s14 }
 0x138   :  { %v2831_v9 = vpop.f32.mrf.mxu0  ;;  %v2229_v13 = vld [vmem:[#allocation5 + $0x68] sm:$0xff]  ;;  %v2783_v63 = vcombine.low %v2230_v39, %v2231_v5  ;;  %v2108_v4 = vstv %s3573_s18  ;;  %s3985_s18 = sld [smem:[#allocation30_spill]] }
 0x139   :  { %v521_v40 = vadd.f32 %v2851_v12, %v322_v10  ;;  %v2853_v41 = vpop.f32.mrf.mxu1  ;;  %v2784_v9 = vcombine.high %v2230_v39, %v2231_v5  ;;  %v2125_v10 = vld [vmem:[#allocation5 + $0x20] sm:$0xff]  ;;  %v2228_v12 = vld [vmem:[#allocation5 + $0x28] sm:$0xff]  ;;  %v2114_v39 = vstv %s3575_s19  ;;  %s3982_s19 = sld [smem:[#allocation27_spill]] }
 0x13a   :  { %v2782_v2 = vcombine.high %v2228_v12, %v2229_v13  ;;  %v2437_v41 = vld [vmem:[#allocation5 + $0xf8] sm:$0xff]  ;;  %v3654_v55 = vld [vmem:[%s3939_s4 + $0x8] sm:$0x3] }
 0x152   :  { %v2871_v14 = vpop.f32.mrf.mxu0 }
 0x153   :  { %v2893_v19 = vpop.f32.mrf.mxu1 }
 0x154   :  { %v2872_v15 = vpop.f32.mrf.mxu0 }
 0x155   :  { %v2873_v16 = vadd.f32 %v2872_v15, %v2871_v14  ;;  %v2894_v21 = vpop.f32.mrf.mxu1  ;;  %v2772_v14 = vcombine.low %v2125_v10, %v2126_v11  ;;  %v2781_v15 = vcombine.low %v2228_v12, %v2229_v13 }
 0x156   :  { %v2874_v17 = vpop.f32.mrf.mxu0  ;;  %v2895_v36 = vadd.f32 %v2894_v21, %v2893_v19  ;;  %v2332_v19 = vld [vmem:[#allocation5 + $0x70] sm:$0xff]  ;;  %v2435_v21 = vld [vmem:[#allocation5 + $0x78] sm:$0xff] }
 0x157   :  { %v720_v18 = vadd.f32 %v2873_v16, %v521_v40  ;;  %v2896_v22 = vpop.f32.mrf.mxu1  ;;  %v2436_v40 = vld [vmem:[#allocation5 + $0xb8] sm:$0xff] }
 0x158   :  { %v2875_v20 = vpop.f32.mrf.mxu0  ;;  %v2802_v17 = vcombine.high %v2436_v40, %v2437_v41 }
 0x159   :  { %v2897_v23 = vpop.f32.mrf.mxu1  ;;  %v919_v42 = vadd.f32 %v2895_v36, %v720_v18  ;;  %v2331_v18 = vld [vmem:[#allocation5 + $0x30] sm:$0xff]  ;;  %v2434_v20 = vld [vmem:[#allocation5 + $0x38] sm:$0xff]  ;;  %v3611_v36 = vld [vmem:[%s3939_s4 + $0x2] sm:$0x3] }
 0x15a   :  { %v2801_v23 = vcombine.low %v2436_v40, %v2437_v41  ;;  %v2308_v40 = vstv %s3587_s25  ;;  %v2314_v41 = vstv %s3981_s0 }
 0x172   :  { %v2915_v24 = vpop.f32.mrf.mxu0 }
 0x173   :  { %v2937_v27 = vpop.f32.mrf.mxu1 }
 0x174   :  { %v2916_v25 = vpop.f32.mrf.mxu0 }
 0x175   :  { %v2938_v29 = vpop.f32.mrf.mxu1  ;;  %v2917_v37 = vadd.f32 %v2916_v25, %v2915_v24  ;;  %v2791_v24 = vcombine.high %v2331_v18, %v2332_v19  ;;  %v2800_v25 = vcombine.high %v2434_v20, %v2435_v21 }
 0x176   :  { %v2918_v26 = vpop.f32.mrf.mxu0  ;;  %v2939_v45 = vadd.f32 %v2938_v29, %v2937_v27  ;;  %v2799_v27 = vcombine.low %v2434_v20, %v2435_v21 }
 0x177   :  { %v2940_v30 = vpop.f32.mrf.mxu1  ;;  %v1118_v44 = vadd.f32 %v2917_v37, %v919_v42  ;;  %v2790_v26 = vcombine.low %v2331_v18, %v2332_v19  ;;  %v3620_v37 = vld [vmem:[%s3939_s4 + $0x4] sm:$0x3]  ;;  %v3625_v42 = vld [vmem:[%s3939_s4 + $0x6] sm:$0x3] }
 0x178   :  { %v2919_v28 = vpop.f32.mrf.mxu0 }
 0x179   :  { %v2941_v31 = vpop.f32.mrf.mxu1  ;;  %v1317_v49 = vadd.f32 %v2939_v45, %v1118_v44 }
 0x17a   :  { %v3606_v31 = vld [vmem:[%s3939_s4] sm:$0x3] }
 0x192   :  { %v2959_v43 = vpop.f32.mrf.mxu0 }
 0x193   :  { %v2981_v50 = vpop.f32.mrf.mxu1 }
 0x194   :  { %v2960_v46 = vpop.f32.mrf.mxu0 }
 0x195   :  { %v2961_v47 = vadd.f32 %v2960_v46, %v2959_v43  ;;  %v2982_v53 = vpop.f32.mrf.mxu1 }
 0x196   :  { %v2962_v48 = vpop.f32.mrf.mxu0  ;;  %v2983_v54 = vadd.f32 %v2982_v53, %v2981_v50  ;;  %v1813_v50 = vstv %s3553_s3 }
 0x197   :  { %v1516_v52 = vadd.f32 %v2961_v47, %v1317_v49  ;;  %v2984_v56 = vpop.f32.mrf.mxu1  ;;  %v1801_v47 = vstv %s3547_s2  ;;  %v1805_v48 = vstv %s3549_s5  ;;  %v1809_v49 = vstv %s3551_s11 }
 0x198   :  { %v2963_v51 = vpop.f32.mrf.mxu0  ;;  %v1908_v56 = vstv %s3559_s13 }
 0x199   :  { %v1715_v32 = vadd.f32 %v2983_v54, %v1516_v52  ;;  %v2985_v60 = vpop.f32.mrf.mxu1  ;;  %v1896_v51 = vstv %s3555_s7  ;;  %v1902_v52 = vstv %s3557_s12  ;;  %s3682_s12 = sld [smem:[#allocation11 + $0x2]] }
 0x19a   :  { %v1999_v60 = vstv %s3563_s15 }
 0x19b   :  { %v3517_v33 = vpack.c.bf16 %v1715_v32, %v1715_v32  ;;  %v3667_v32 = vld [vmem:[%s3939_s4 + $0xa] sm:$0x3] }
 0x19d   :  { %2741 = vmatmul.mubr.msk.bf16.vlgmr.msra.gmra.mxu0 %vm1753_vm0, %v3517_v33  ;;  %2749 = vmatmul.mubr.msk.bf16.vlgmr.msra.gmra.mxu1 %vm1753_vm0, %v3517_v33 }
 0x19e   :  { %1968 = vmatpush1.bf16.msra.mxu0 %v2756_v0  ;;  %2071 = vmatpush1.bf16.msra.mxu1 %v2765_v38  ;;  %v2773_v0 = vcombine.high %v2125_v10, %v2126_v11  ;;  %v2334_v38 = vld [vmem:[#allocation5 + $0xf0] sm:$0xff]  ;;  %v3694_v10 = vld [vmem:[%s3939_s4 + $0xc] sm:$0x3]  ;;  %v3699_v11 = vld [vmem:[%s3939_s4 + $0xe] sm:$0x3] }
 0x19f   :  { %1969 = vmatprep.subr.bf16.mxu0 %v2755_v61  ;;  %2072 = vmatprep.subr.bf16.mxu1 %v2764_v1  ;;  %v2793_v16 = vcombine.high %v2333_v34, %v2334_v38  ;;  %v2792_v22 = vcombine.low %v2333_v34, %v2334_v38  ;;  %v2011_v61 = vstv %s3567_s16  ;;  %v2017_v1 = vstv %s3569_s6  ;;  %s4014_s6 = sld [smem:[#allocation31_spill]] }
 0x1a0   :  { %1987 = vmatprep.mubr.bf16.mxu0 %v3240_v35  ;;  %2090 = vmatprep.mubr.bf16.mxu1 %v3240_v35 }
 0x1a2   :  { %1970 = vmatpush1.bf16.msra.mxu0 %v2754_v6  ;;  %2073 = vmatpush1.bf16.msra.mxu1 %v2763_v7  ;;  %v2120_v6 = vstv %s3577_s20  ;;  %s3983_s20 = sld [smem:[#allocation28_spill]] }
 0x1a3   :  { %2173 = vmatprep.subr.bf16.mxu0 %v2775_v8  ;;  %2276 = vmatprep.subr.bf16.mxu1 %v2784_v9 }
 0x1a5   :  { %2758 = vmatmul.mubr.msk.bf16.vlgmr.msra.gmra.mxu0 %vm1753_vm0, %v3517_v33  ;;  %2767 = vmatmul.mubr.msk.bf16.vlgmr.msra.gmra.mxu1 %vm1753_vm0, %v3517_v33 }
 0x1a6   :  { %2174 = vmatpush1.bf16.msra.mxu0 %v2774_v62  ;;  %2277 = vmatpush1.bf16.msra.mxu1 %v2783_v63  ;;  %v2205_v62 = vstv %s3579_s21  ;;  %v2211_v63 = vstv %s3581_s22 }
 0x1a7   :  { %2175 = vmatprep.subr.bf16.mxu0 %v2773_v0  ;;  %2278 = vmatprep.subr.bf16.mxu1 %v2782_v2  ;;  %v2217_v0 = vstv %s3583_s23  ;;  %v2223_v2 = vstv %s3585_s24 }
 0x1a8   :  { %2193 = vmatprep.mubr.bf16.mxu0 %v3240_v35  ;;  %2296 = vmatprep.mubr.bf16.mxu1 %v3240_v35 }
 0x1aa   :  { %2176 = vmatpush1.bf16.msra.mxu0 %v2772_v14  ;;  %2279 = vmatpush1.bf16.msra.mxu1 %v2781_v15 }
 0x1ab   :  { %2379 = vmatprep.subr.bf16.mxu0 %v2793_v16  ;;  %2482 = vmatprep.subr.bf16.mxu1 %v2802_v17  ;;  %v2320_v16 = vstv %s3982_s19 }
 0x1ad   :  { %2776 = vmatmul.mubr.msk.bf16.vlgmr.msra.gmra.mxu0 %vm1753_vm0, %v3517_v33  ;;  %2785 = vmatmul.mubr.msk.bf16.vlgmr.msra.gmra.mxu1 %vm1753_vm0, %v3517_v33 }
 0x1ae   :  { %2380 = vmatpush1.bf16.msra.mxu0 %v2792_v22  ;;  %2483 = vmatpush1.bf16.msra.mxu1 %v2801_v23 }
 0x1af   :  { %2381 = vmatprep.subr.bf16.mxu0 %v2791_v24  ;;  %2484 = vmatprep.subr.bf16.mxu1 %v2800_v25 }
 0x1b0   :  { %2399 = vmatprep.mubr.bf16.mxu0 %v3240_v35  ;;  %2502 = vmatprep.mubr.bf16.mxu1 %v3240_v35  ;;  %v1723_v35 = vlaneseq }
 0x1b2   :  { %2382 = vmatpush1.bf16.msra.mxu0 %v2790_v26  ;;  %2485 = vmatpush1.bf16.msra.mxu1 %v2799_v27  ;;  %v1724_v28 = vshrl.u32 %v1723_v35, 7 }
 0x1b4   :  { %v3597_v29 = vsub.s32 0, %v1724_v28  ;;  %v3599_v30 = vsub.s32 1, %v1724_v28 }
 0x1b5   :  { %2794 = vmatmul.mubr.msk.bf16.vlgmr.msra.gmra.mxu0 %vm1753_vm0, %v3517_v33  ;;  %2803 = vmatmul.mubr.msk.bf16.vlgmr.msra.gmra.mxu1 %vm1753_vm0, %v3517_v33  ;;  %v2005_v33 = vstv %s3565_s8  ;;  %s3701_s8 = sld [smem:[#allocation11 + $0x3]] }
 0x1b6   :  { %v1726_v43 = vrot.slane %v3606_v31, %v3597_v29  ;;  %v1825_v44 = vrot.slane %v3611_v36, %v3597_v29  ;;  %v1730_v45 = vrot.slane %v3606_v31, %v3599_v30  ;;  %v1829_v46 = vrot.slane %v3611_v36, %v3599_v30 }
 0x1b7   :  { %v1928_v53 = vrot.slane %v3620_v37, %v3597_v29  ;;  %v2031_v54 = vrot.slane %v3625_v42, %v3597_v29  ;;  %v1932_v58 = vrot.slane %v3620_v37, %v3599_v30  ;;  %v2035_v59 = vrot.slane %v3625_v42, %v3599_v30 }
 0x1b8   :  { %v2134_v5 = vrot.slane %v3654_v55, %v3597_v29  ;;  %v2237_v7 = vrot.slane %v3667_v32, %v3597_v29  ;;  %v2138_v8 = vrot.slane %v3654_v55, %v3599_v30  ;;  %v2241_v9 = vrot.slane %v3667_v32, %v3599_v30 }
 0x1b9   :  { %v2340_v18 = vrot.slane %v3694_v10, %v3597_v29  ;;  %v2443_v19 = vrot.slane %v3699_v11, %v3597_v29 }
 0x25d   :  { %v1791_v12 = vpop.f32.mrf.mxu0  ;;  %v1886_v13 = vpop.f32.mrf.mxu1 }
 0x25e   :  { %v1792_v34 = vadd.f32 %v1791_v12, %v1726_v43  ;;  %v1887_v38 = vadd.f32 %v1886_v13, %v1825_v44 }
 0x25f   :  { %v1793_v14 = vpop.f32.mrf.mxu0  ;;  %v1888_v15 = vpop.f32.mrf.mxu1 }
 0x260   :  { %v1794_v20 = vadd.f32 %v1793_v14, %v1730_v45  ;;  %v1889_v21 = vadd.f32 %v1888_v15, %v1829_v46  ;;  %v1798_v24 = vmax.f32 %v1792_v34, 0.0  ;;  %v1893_v31 = vmax.f32 %v1887_v38, 0.0 }
 0x261   :  { %v1795_v25 = vpop.f32.mrf.mxu0  ;;  %v1890_v26 = vpop.f32.mrf.mxu1 }
 0x262   :  { %v1799_v15 = vmax.f32 %v1794_v20, 0.0  ;;  %v1894_v38 = vmax.f32 %v1889_v21, 0.0  ;;  %v1802_v44 = vmul.f32 %v1801_v47, %v1798_v24  ;;  %v1814_v13 = vmul.f32 %v1813_v50, %v1798_v24 }
 0x263   :  { %v1796_v45 = vpop.f32.mrf.mxu0  ;;  %v1891_v46 = vpop.f32.mrf.mxu1  ;;  %v1897_v20 = vmul.f32 %v1896_v51, %v1893_v31  ;;  %v1903_v21 = vmul.f32 %v1902_v52, %v1893_v31  ;;  %v1909_v26 = vmul.f32 %v1908_v56, %v1893_v31  ;;  %v1915_v25 = vmul.f32 %v1914_v57, %v1893_v31 }
 0x264   :  { %v1806_v45 = vmul.f32 %v1805_v48, %v1798_v24  ;;  %v1810_v46 = vmul.f32 %v1809_v49, %v1798_v24  ;;  %v1803_v14 = vmul.f32 %v1801_v47, %v1799_v15  ;;  %v1807_v43 = vmul.f32 %v1805_v48, %v1799_v15 }
 0x265   :  { %v1989_v12 = vpop.f32.mrf.mxu0  ;;  %v2092_v34 = vpop.f32.mrf.mxu1  ;;  %v1811_v36 = vmul.f32 %v1809_v49, %v1799_v15  ;;  %v1898_v24 = vmul.f32 %v1896_v51, %v1894_v38  ;;  %v1815_v27 = vmul.f32 %v1813_v50, %v1799_v15  ;;  %v1904_v48 = vmul.f32 %v1902_v52, %v1894_v38 }
 0x266   :  { %v1990_v23 = vadd.f32 %v1989_v12, %v1928_v53  ;;  %v2093_v31 = vadd.f32 %v2092_v34, %v2031_v54  ;;  %v1910_v49 = vmul.f32 %v1908_v56, %v1894_v38  ;;  %v1916_v50 = vmul.f32 %v1914_v57, %v1894_v38 }
 0x267   :  { %v1991_v28 = vpop.f32.mrf.mxu0  ;;  %v2094_v35 = vpop.f32.mrf.mxu1  ;;  %v1899_v12 = vadd.f32 %v1897_v20, %v1802_v44  ;;  %v1905_v34 = vadd.f32 %v1903_v21, %v1806_v45  ;;  %v1911_v37 = vadd.f32 %v1909_v26, %v1810_v46  ;;  %v1900_v52 = vadd.f32 %v1898_v24, %v1803_v14 }
 0x268   :  { %v1992_v47 = vadd.f32 %v1991_v28, %v1932_v58  ;;  %v2095_v51 = vadd.f32 %v2094_v35, %v2035_v59  ;;  %v1996_v58 = vmax.f32 %v1990_v23, 0.0  ;;  %v1917_v28 = vadd.f32 %v1915_v25, %v1814_v13 }
 0x269   :  { %v1993_v53 = vpop.f32.mrf.mxu0  ;;  %v2096_v54 = vpop.f32.mrf.mxu1  ;;  %v2099_v15 = vmax.f32 %v2093_v31, 0.0  ;;  %v1906_v44 = vadd.f32 %v1904_v48, %v1807_v43  ;;  %v1912_v23 = vadd.f32 %v1910_v49, %v1811_v36  ;;  %v1918_v13 = vadd.f32 %v1916_v50, %v1815_v27 }
 0x26a   :  { %v1997_v22 = vmax.f32 %v1992_v47, 0.0  ;;  %v2000_v57 = vmul.f32 %v1999_v60, %v1996_v58  ;;  %v2006_v42 = vmul.f32 %v2005_v33, %v1996_v58  ;;  %v2012_v59 = vmul.f32 %v2011_v61, %v1996_v58 }
 0x26b   :  { %v1994_v56 = vpop.f32.mrf.mxu0  ;;  %v2097_v17 = vpop.f32.mrf.mxu1  ;;  %v2018_v35 = vmul.f32 %v2017_v1, %v1996_v58  ;;  %v2100_v14 = vmax.f32 %v2095_v51, 0.0  ;;  %v2103_v20 = vmul.f32 %v2102_v3, %v2099_v15  ;;  %v2109_v21 = vmul.f32 %v2108_v4, %v2099_v15 }
 0x26c   :  { %v2002_v25 = vadd.f32 %v2000_v57, %v1899_v12  ;;  %v2008_v26 = vadd.f32 %v2006_v42, %v1905_v34  ;;  %v2014_v45 = vadd.f32 %v2012_v59, %v1911_v37  ;;  %v2001_v24 = vmul.f32 %v1999_v60, %v1997_v22 }
 0x26d   :  { %v2195_v17 = vpop.f32.mrf.mxu0  ;;  %v2298_v38 = vpop.f32.mrf.mxu1  ;;  %v2020_v46 = vadd.f32 %v2018_v35, %v1917_v28  ;;  %v2007_v36 = vmul.f32 %v2005_v33, %v1997_v22  ;;  %v2115_v31 = vmul.f32 %v2114_v39, %v2099_v15  ;;  %v2121_v47 = vmul.f32 %v2120_v6, %v2099_v15 }
 0x26e   :  { %v2013_v48 = vmul.f32 %v2011_v61, %v1997_v22  ;;  %v2019_v49 = vmul.f32 %v2017_v1, %v1997_v22  ;;  %v2105_v50 = vadd.f32 %v2103_v20, %v2002_v25  ;;  %v2111_v51 = vadd.f32 %v2109_v21, %v2008_v26 }
 0x26f   :  { %v2197_v27 = vpop.f32.mrf.mxu0  ;;  %v2300_v43 = vpop.f32.mrf.mxu1  ;;  %v2003_v53 = vadd.f32 %v2001_v24, %v1900_v52  ;;  %v2009_v54 = vadd.f32 %v2007_v36, %v1906_v44  ;;  %v2117_v33 = vadd.f32 %v2115_v31, %v2014_v45  ;;  %v2123_v34 = vadd.f32 %v2121_v47, %v2020_v46 }
 0x270   :  { %v2104_v37 = vmul.f32 %v2102_v3, %v2100_v14  ;;  %v2110_v58 = vmul.f32 %v2108_v4, %v2100_v14  ;;  %v2196_v61 = vadd.f32 %v2195_v17, %v2134_v5  ;;  %v2299_v1 = vadd.f32 %v2298_v38, %v2237_v7 }
 0x271   :  { %v2199_v60 = vpop.f32.mrf.mxu0  ;;  %v2302_v12 = vpop.f32.mrf.mxu1  ;;  %v2198_v22 = vadd.f32 %v2197_v27, %v2138_v8  ;;  %v2301_v28 = vadd.f32 %v2300_v43, %v2241_v9  ;;  %v2015_v4 = vadd.f32 %v2013_v48, %v1912_v23  ;;  %v2021_v15 = vadd.f32 %v2019_v49, %v1918_v13 }
 0x272   :  { %v2116_v5 = vmul.f32 %v2114_v39, %v2100_v14  ;;  %v2122_v7 = vmul.f32 %v2120_v6, %v2100_v14  ;;  %v2106_v56 = vadd.f32 %v2104_v37, %v2003_v53  ;;  %v2112_v55 = vadd.f32 %v2110_v58, %v2009_v54 }
 0x273   :  { %v2200_v52 = vpop.f32.mrf.mxu0  ;;  %v2303_v3 = vpop.f32.mrf.mxu1  ;;  %v2202_v8 = vmax.f32 %v2196_v61, 0.0  ;;  %v2305_v32 = vmax.f32 %v2299_v1, 0.0  ;;  %v2203_v42 = vmax.f32 %v2198_v22, 0.0  ;;  %v2306_v59 = vmax.f32 %v2301_v28, 0.0 }
 0x274   :  { %v2118_v47 = vadd.f32 %v2116_v5, %v2015_v4  ;;  %v2124_v48 = vadd.f32 %v2122_v7, %v2021_v15  ;;  %v3996_v52 = vrot.slane %v3694_v10, %v3599_v30  ;;  %v3997_v4 = vrot.slane %v3699_v11, %v3599_v30 }
 0x275   :  { %v2401_v9 = vpop.f32.mrf.mxu0  ;;  %v2504_v57 = vpop.f32.mrf.mxu1  ;;  %v2206_v6 = vmul.f32 %v2205_v62, %v2202_v8  ;;  %v2212_v44 = vmul.f32 %v2211_v63, %v2202_v8  ;;  %v2218_v23 = vmul.f32 %v2217_v0, %v2202_v8  ;;  %v2224_v13 = vmul.f32 %v2223_v2, %v2202_v8 }
 0x276   :  { %v2402_v35 = vadd.f32 %v2401_v9, %v2340_v18  ;;  %v2505_v39 = vadd.f32 %v2504_v57, %v2443_v19  ;;  %v2309_v18 = vmul.f32 %v2308_v40, %v2305_v32  ;;  %v2315_v38 = vmul.f32 %v2314_v41, %v2305_v32 }
 0x277   :  { %v2403_v14 = vpop.f32.mrf.mxu0  ;;  %v2506_v17 = vpop.f32.mrf.mxu1  ;;  %v2321_v29 = vmul.f32 %v2320_v16, %v2305_v32  ;;  %v3994_v19 = vstv %s3983_s20  ;;  %v2208_v26 = vadd.f32 %v2206_v6, %v2105_v50  ;;  %v2214_v45 = vadd.f32 %v2212_v44, %v2111_v51 }
 0x278   :  { %v2327_v25 = vmul.f32 %v3994_v19, %v2305_v32  ;;  %v2220_v46 = vadd.f32 %v2218_v23, %v2117_v33  ;;  %v2226_v20 = vadd.f32 %v2224_v13, %v2123_v34  ;;  %v2207_v36 = vmul.f32 %v2205_v62, %v2203_v42 }
 0x279   :  { %v2405_v21 = vpop.f32.mrf.mxu0  ;;  %v2508_v24 = vpop.f32.mrf.mxu1  ;;  %v2213_v27 = vmul.f32 %v2211_v63, %v2203_v42  ;;  %v2219_v43 = vmul.f32 %v2217_v0, %v2203_v42  ;;  %v2225_v31 = vmul.f32 %v2223_v2, %v2203_v42  ;;  %v2311_v49 = vadd.f32 %v2309_v18, %v2208_v26 }
 0x27a   :  { %v2317_v50 = vadd.f32 %v2315_v38, %v2214_v45  ;;  %v2323_v54 = vadd.f32 %v2321_v29, %v2220_v46  ;;  %v2329_v60 = vadd.f32 %v2327_v25, %v2226_v20  ;;  %v2209_v62 = vadd.f32 %v2207_v36, %v2106_v56 }
 0x27b   :  { %v2406_v51 = vpop.f32.mrf.mxu0  ;;  %v2509_v53 = vpop.f32.mrf.mxu1  ;;  %v2215_v63 = vadd.f32 %v2213_v27, %v2112_v55  ;;  %v2221_v12 = vadd.f32 %v2219_v43, %v2118_v47  ;;  %v2227_v0 = vadd.f32 %v2225_v31, %v2124_v48  ;;  %v2310_v2 = vmul.f32 %v2308_v40, %v2306_v59 }
 0x27c   :  { %v2316_v33 = vmul.f32 %v2314_v41, %v2306_v59  ;;  %v2322_v34 = vmul.f32 %v2320_v16, %v2306_v59  ;;  %v3995_v37 = vmov %v3994_v19  ;;  %v2408_v61 = vmax.f32 %v2402_v35, 0.0 }
 0x27d   :  { %v2328_v58 = vmul.f32 %v3995_v37, %v2306_v59  ;;  %v2511_v1 = vmax.f32 %v2505_v39, 0.0  ;;  %v2312_v22 = vadd.f32 %v2310_v2, %v2209_v62  ;;  %v2404_v3 = vadd.f32 %v2403_v14, %v3996_v52 }
 0x27e   :  { %v2318_v28 = vadd.f32 %v2316_v33, %v2215_v63  ;;  %v2507_v40 = vadd.f32 %v2506_v17, %v3997_v4  ;;  %v3998_v15 = vstv %s3984_s17  ;;  %v3999_v41 = vstv %s3985_s18 }
 0x27f   :  { %v2412_v5 = vmul.f32 %v3998_v15, %v2408_v61  ;;  %v2418_v7 = vmul.f32 %v3999_v41, %v2408_v61  ;;  %v4000_v56 = vstv %s3613_s1  ;;  %v4001_v55 = vstv %s3615_s28 }
 0x280   :  { %v2424_v16 = vmul.f32 %v4000_v56, %v2408_v61  ;;  %v2430_v8 = vmul.f32 %v4001_v55, %v2408_v61  ;;  %v4002_v32 = vstv %s3627_s29  ;;  %v4003_v57 = vstv %s3637_s9 }
 0x281   :  { %v2515_v9 = vmul.f32 %v4002_v32, %v2511_v1  ;;  %v2521_v42 = vmul.f32 %v4003_v57, %v2511_v1  ;;  %v4004_v59 = vstv %s3643_s26  ;;  %v4005_v35 = vstv %s3656_s30 }
 0x282   :  { %v2527_v10 = vmul.f32 %v4004_v59, %v2511_v1  ;;  %v2533_v30 = vmul.f32 %v4005_v35, %v2511_v1  ;;  %v2414_v11 = vadd.f32 %v2412_v5, %v2311_v49  ;;  %v2420_v39 = vadd.f32 %v2418_v7, %v2317_v50 }
 0x283   :  { %v2426_v6 = vadd.f32 %v2424_v16, %v2323_v54  ;;  %v2432_v44 = vadd.f32 %v2430_v8, %v2329_v60  ;;  %v2324_v23 = vadd.f32 %v2322_v34, %v2221_v12  ;;  %v2330_v13 = vadd.f32 %v2328_v58, %v2227_v0 }
 0x284   :  { %v2409_v14 = vmax.f32 %v2404_v3, 0.0  ;;  %v2512_v17 = vmax.f32 %v2507_v40, 0.0  ;;  %v2517_v18 = vadd.f32 %v2515_v9, %v2414_v11  ;;  %v2523_v38 = vadd.f32 %v2521_v42, %v2420_v39 }
 0x285   :  { %v2529_v29 = vadd.f32 %v2527_v10, %v2426_v6  ;;  %v2535_v19 = vadd.f32 %v2533_v30, %v2432_v44  ;;  %v4006_v25 = vmov %v3998_v15  ;;  %v4007_v45 = vmov %v3999_v41 }
 0x286   :  { %v2413_v26 = vmul.f32 %v4006_v25, %v2409_v14  ;;  %v2419_v46 = vmul.f32 %v4007_v45, %v2409_v14  ;;  %v4008_v20 = vmov %v4000_v56  ;;  %v4009_v24 = vmov %v4001_v55 }
 0x287   :  { %v2425_v21 = vmul.f32 %v4008_v20, %v2409_v14  ;;  %v2431_v36 = vmul.f32 %v4009_v24, %v2409_v14  ;;  %v4010_v27 = vstv %s3669_s27  ;;  %v4011_v31 = vstv %s3675_s10 }
 0x288   :  { %v2539_v43 = vadd.f32 %v4010_v27, %v2517_v18  ;;  %v2545_v47 = vadd.f32 %v4011_v31, %v2523_v38  ;;  %v4012_v48 = vstv %s3682_s12  ;;  %v4013_v50 = vstv %s3701_s8 }
 0x289   :  { %v2551_v49 = vadd.f32 %v4012_v48, %v2529_v29  ;;  %v2557_v51 = vadd.f32 %v4013_v50, %v2535_v19  ;;  %v2415_v53 = vadd.f32 %v2413_v26, %v2312_v22  ;;  %v2421_v54 = vadd.f32 %v2419_v46, %v2318_v28 }
 0x28a   :  { %v2427_v60 = vadd.f32 %v2425_v21, %v2324_v23  ;;  %v2433_v62 = vadd.f32 %v2431_v36, %v2330_v13  ;;  %2541 = vst [vmem:[%s4014_s6] sm:$0xff] %v2539_v43  ;;  %2547 = vst [vmem:[%s4014_s6 + $0x10] sm:$0xff] %v2545_v47  ;;  %v4015_v63 = vmov %v4002_v32  ;;  %v4016_v0 = vmov %v4003_v57 }
 0x28b   :  { %2553 = vst [vmem:[%s4014_s6 + $0x20] sm:$0xff] %v2551_v49  ;;  %2559 = vst [vmem:[%s4014_s6 + $0x30] sm:$0xff] %v2557_v51  ;;  %v2516_v12 = vmul.f32 %v4015_v63, %v2512_v17  ;;  %v2522_v2 = vmul.f32 %v4016_v0, %v2512_v17  ;;  %v4017_v33 = vmov %v4004_v59  ;;  %v4018_v37 = vmov %v4005_v35 }
 0x28c   :  { %v2528_v34 = vmul.f32 %v4017_v33, %v2512_v17  ;;  %v2534_v58 = vmul.f32 %v4018_v37, %v2512_v17  ;;  %v4019_v52 = vmov %v4010_v27  ;;  %v4020_v4 = vmov %v4011_v31 }
 0x28d   :  { %v2518_v61 = vadd.f32 %v2516_v12, %v2415_v53  ;;  %v2524_v1 = vadd.f32 %v2522_v2, %v2421_v54  ;;  %v4021_v15 = vmov %v4012_v48  ;;  %v4022_v41 = vmov %v4013_v50 }
 0x28e   :  { %v2530_v22 = vadd.f32 %v2528_v34, %v2427_v60  ;;  %v2536_v28 = vadd.f32 %v2534_v58, %v2433_v62 }
 0x28f   :  { %v2540_v3 = vadd.f32 %v4019_v52, %v2518_v61  ;;  %v2546_v40 = vadd.f32 %v4020_v4, %v2524_v1 }
 0x290   :  { %v2552_v5 = vadd.f32 %v4021_v15, %v2530_v22  ;;  %v2558_v7 = vadd.f32 %v4022_v41, %v2536_v28 }
 0x291   :  { %2542 = vst [vmem:[%s4014_s6 + $0x8] sm:$0xff] %v2540_v3  ;;  %2548 = vst [vmem:[%s4014_s6 + $0x18] sm:$0xff] %v2546_v40 }
 0x292   :  { %2554 = vst [vmem:[%s4014_s6 + $0x28] sm:$0xff] %v2552_v5  ;;  %2560 = vst [vmem:[%s4014_s6 + $0x38] sm:$0xff] %v2558_v7 }
 0x293   :  { %2565 = vsyncpa [#allocation3], 1 }
 0x294   :  { %2566 = vsyncpa [#allocation6], 1 }
 0x295   :  { %2567 = vsyncpa [#allocation4], 1 }
 0x296   :  { %2568 = vsyncpa [#allocation9], 1 }
 0x297   :  { %2569 = vsyncpa [#allocation12], 1 }

</bundles_post_ra>
